<compile_context>
chip_gen: v6e
topology: v6e:2x2x1
jax: 0.10.0
libtpu: 0.0.40
codegen_flags: <defaults>
</compile_context>

<pallas_src>
import numpy as np
import jax
import jax.numpy as jnp
from jax.experimental import pallas as pl
from jax.experimental.pallas import tpu as pltpu

N_JOINTS = 21
N_DIMS = N_JOINTS * 3          # 63 body-pose dims (fixed by the module)
N_REC6D = N_JOINTS * 6         # 126 decoder 6D output dims
NUM_NEURONS = 64               # synthetic hidden width (real VPoser v02 uses 512)
LATENT_D = 32                  # latent size (real VPoser v02 uses 32)
LANE = 128                     # TPU lane width: every feature dim padded to this
N_MATS = 5                     # weight slab holds 5 stacked (128,128) matrices
MU_OFF = 0                     # mu head lives in output lanes [0, 32)
EPS_OFF = 64                   # eps lives in x-slab lanes [64, 96); logvar head ditto


def _round_up(x, m):
    return ((x + m - 1) // m) * m


def _leaky_relu(x, slope=0.01):
    return jnp.where(x > 0, x, slope * x)


def _softplus(x):
    # numerically-stable softplus, matches torch.nn.functional.softplus(beta=1)
    return jnp.maximum(x, 0.0) + jnp.log1p(jnp.exp(-jnp.abs(x)))


# ---------------- fused MLP kernel ----------------

def vposer_mlp_kernel(x_ref, w_ref, b_ref, rec_ref):
    """Folded VPoser encoder -> reparameterized sample -> decoder (bf16 MXU, f32 acc).

    x_ref   : (TB, 128) bf16  poses_body in lanes [0,63), eps in lanes [64,96)
    w_ref   : (640, 128) bf16 5 stacked (128,128) zero-padded weight matrices
    b_ref   : (8, 128)  f32   5 bias rows (+3 zero pad rows)
    rec_ref : (TB, 128) f32   decoder 6D output, COMPONENT-MAJOR, valid lanes [:126]
    """
    def W(i):
        return w_ref[pl.ds(i * LANE, LANE), :]          # static slice -> zero cost

    def bias(i):
        return b_ref[pl.ds(i, 1), :]                    # (1, 128), broadcasts over rows

    x = x_ref[...]                                      # bf16

    # encoder (BN1 folded into Linear1) -> LeakyReLU
    h = _leaky_relu(jnp.dot(x, W(0), preferred_element_type=jnp.float32) + bias(0))

    # fused mu/logvar head (BN2/Linear2/Linear3 pre-folded): one matmul for both heads.
    head = jnp.dot(h.astype(jnp.bfloat16), W(1),
                   preferred_element_type=jnp.float32) + bias(1)

    # Normal(mu, softplus(lv)).sample() with supplied eps, done with lane masks:
    #   lanes [0,32)   -> mu
    #   lanes [64,96)  -> softplus(lv) * eps        (eps packed in the x slab)
    # W(2) has dw1 duplicated in rows [0,32) and [64,96), so v @ W(2) == z @ dw1 exactly.
    lane = jax.lax.broadcasted_iota(jnp.int32, head.shape, 1)
    mu_part = jnp.where(lane < LATENT_D, head, 0.0)
    eps_f32 = jnp.where((lane >= EPS_OFF) & (lane < EPS_OFF + LATENT_D),
                        x.astype(jnp.float32), 0.0)
    v = mu_part + _softplus(head) * eps_f32

    # decoder: Linear -> LeakyReLU -> Linear -> LeakyReLU -> Linear(21*6, component-major)
    d = _leaky_relu(jnp.dot(v.astype(jnp.bfloat16), W(2),
                            preferred_element_type=jnp.float32) + bias(2))
    d = _leaky_relu(jnp.dot(d.astype(jnp.bfloat16), W(3),
                            preferred_element_type=jnp.float32) + bias(3))
    rec_ref[...] = jnp.dot(d.astype(jnp.bfloat16), W(4),
                           preferred_element_type=jnp.float32) + bias(4)


def vposer_mlp(x_slab, w_slab, b_slab, tile_b):
    Bp = x_slab.shape[0]
    return pl.pallas_call(
        vposer_mlp_kernel,
        out_shape=jax.ShapeDtypeStruct((Bp, LANE), jnp.float32),
        grid_spec=pltpu.PrefetchScalarGridSpec(
            num_scalar_prefetch=0,
            grid=(Bp // tile_b,),
            in_specs=[
                pl.BlockSpec((tile_b, LANE), lambda i: (i, 0)),         # activations stream
                pl.BlockSpec((N_MATS * LANE, LANE), lambda i: (0, 0)),  # weights resident
                pl.BlockSpec((8, LANE), lambda i: (0, 0)),              # biases resident
            ],
            out_specs=pl.BlockSpec((tile_b, LANE), lambda i: (i, 0)),
        ),
        compiler_params=pltpu.CompilerParams(
            dimension_semantics=("parallel",)),
    )(x_slab, w_slab, b_slab)


# ---------------- per-joint geometry (plain JAX, lane-dense (B,21) planes) ----------------
# TODO(synk): atan2 in matrot2aa has no reliable Mosaic lowering; the quaternion epilogue
#             stays in plain JAX but now runs on lane-dense (B,21) component planes.

def _axis_angle_from_planes(v0, v1, v2, v3, v4, v5, eps=1e-6):
    """ContinousRotReprDecoder + torchgeometry rotation_matrix_to_angle_axis, componentwise.

    Inputs are the six (B, 21) rot6d component planes; returns (ax, ay, az) planes.
    """
    # Gram-Schmidt: a1 = (v0,v2,v4), a2 = (v1,v3,v5); R columns = [b1 b2 b3]
    n1 = jnp.maximum(jnp.sqrt(v0 * v0 + v2 * v2 + v4 * v4), 1e-12)
    b1x, b1y, b1z = v0 / n1, v2 / n1, v4 / n1
    dot = b1x * v1 + b1y * v3 + b1z * v5
    u2x, u2y, u2z = v1 - dot * b1x, v3 - dot * b1y, v5 - dot * b1z
    n2 = jnp.maximum(jnp.sqrt(u2x * u2x + u2y * u2y + u2z * u2z), 1e-12)
    b2x, b2y, b2z = u2x / n2, u2y / n2, u2z / n2
    b3x = b1y * b2z - b1z * b2y
    b3y = b1z * b2x - b1x * b2z
    b3z = b1x * b2y - b1y * b2x

    # m = R^T (torchgeometry convention)
    m00, m01, m02 = b1x, b1y, b1z
    m10, m11, m12 = b2x, b2y, b2z
    m20, m21, m22 = b3x, b3y, b3z

    mask_d2 = m22 < eps
    mask_d0_d1 = m00 > m11
    mask_d0_nd1 = m00 < -m11

    t0 = 1.0 + m00 - m11 - m22
    t1 = 1.0 - m00 + m11 - m22
    t2 = 1.0 - m00 - m11 + m22
    t3 = 1.0 + m00 + m11 + m22

    q0 = (m12 - m21, t0, m01 + m10, m20 + m02)
    q1 = (m20 - m02, m01 + m10, t1, m12 + m21)
    q2 = (m01 - m10, m20 + m02, m12 + m21, t2)
    q3 = (t3, m12 - m21, m20 - m02, m01 - m10)

    f = lambda m: m.astype(v0.dtype)
    c0 = f(mask_d2 & mask_d0_d1)
    c1 = f(mask_d2 & (~mask_d0_d1))
    c2 = f((~mask_d2) & mask_d0_nd1)
    c3 = f((~mask_d2) & (~mask_d0_nd1))

    t = t0 * c0 + t1 * c1 + t2 * c2 + t3 * c3
    s = 0.5 / jnp.sqrt(t)
    qw = (q0[0] * c0 + q1[0] * c1 + q2[0] * c2 + q3[0] * c3) * s
    qx = (q0[1] * c0 + q1[1] * c1 + q2[1] * c2 + q3[1] * c3) * s
    qy = (q0[2] * c0 + q1[2] * c1 + q2[2] * c2 + q3[2] * c3) * s
    qz = (q0[3] * c0 + q1[3] * c1 + q2[3] * c2 + q3[3] * c3) * s

    sin_sq = qx * qx + qy * qy + qz * qz
    sin_t = jnp.sqrt(sin_sq)
    two_theta = 2.0 * jnp.where(qw < 0.0,
                                jnp.arctan2(-sin_t, -qw),
                                jnp.arctan2(sin_t, qw))
    k = jnp.where(sin_sq > 0.0,
                  two_theta / jnp.where(sin_t > 0.0, sin_t, 1.0), 2.0)
    return qx * k, qy * k, qz * k


# ---------------- parameter setup (deterministic, synthetic) ----------------

def init_params(key, h=NUM_NEURONS, l=LATENT_D, n=N_DIMS):
    keys = jax.random.split(key, 10)

    def lin(k, fan_in, fan_out):
        kw, kb = jax.random.split(k)
        lim = 1.0 / jnp.sqrt(fan_in)
        w = jax.random.uniform(kw, (fan_in, fan_out), jnp.float32, -lim, lim)
        b = jax.random.uniform(kb, (1, fan_out), jnp.float32, -lim, lim)
        return w, b

    def bn_folded(k, dim):
        k1, k2, k3, k4 = jax.random.split(k, 4)
        gamma = 1.0 + 0.1 * jax.random.normal(k1, (1, dim), jnp.float32)
        beta = 0.1 * jax.random.normal(k2, (1, dim), jnp.float32)
        run_mean = 0.1 * jax.random.normal(k3, (1, dim), jnp.float32)
        run_var = 1.0 + 0.1 * jax.random.uniform(k4, (1, dim), jnp.float32)
        scale = gamma / jnp.sqrt(run_var + 1e-5)
        shift = beta - run_mean * scale
        return scale, shift

    bn1s, bn1b = bn_folded(keys[0], n)
    w1, b1 = lin(keys[1], n, h)
    bn2s, bn2b = bn_folded(keys[2], h)
    w2, b2 = lin(keys[3], h, h)
    w3, b3 = lin(keys[4], h, h)
    wmu, bmu = lin(keys[5], h, l)
    wlv, blv = lin(keys[6], h, l)
    dw1, db1 = lin(keys[7], l, h)
    dw2, db2 = lin(keys[8], h, h)
    dw3, db3 = lin(keys[9], h, N_REC6D)
    return (bn1s, bn1b, w1, b1, bn2s, bn2b, w2, b2, w3, b3,
            wmu, bmu, wlv, blv, dw1, db1, dw2, db2, dw3, db3)


def pack_params(params):
    """One-time offline fold + lane-pad + pack into 2 slabs (exact rewrites, then bf16)."""
    (bn1s, bn1b, w1, b1, bn2s, bn2b, w2, b2, w3, b3,
     wmu, bmu, wlv, blv, dw1, db1, dw2, db2, dw3, db3) = params

    # fold eval-BN1 into Linear1
    w1f = bn1s.reshape(-1, 1) * w1                       # (63, H)
    b1f = bn1b @ w1 + b1                                 # (1, H)

    # fold eval-BN2 + Linear2 + Linear3 into the mu / logvar heads
    a = bn2s.reshape(-1, 1) * w2                         # (H, H)
    c = bn2b @ w2 + b2                                   # (1, H)
    a3 = a @ w3                                          # (H, H)
    c3 = c @ w3 + b3                                     # (1, H)
    wmu_f, bmu_f = a3 @ wmu, c3 @ wmu + bmu              # (H, L), (1, L)
    wlv_f, blv_f = a3 @ wlv, c3 @ wlv + blv

    def padw(w):
        out = jnp.zeros((LANE, LANE), jnp.float32)
        return out.at[:w.shape[0], :w.shape[1]].set(w)

    def padb(b):
        out = jnp.zeros((1, LANE), jnp.float32)
        return out.at[:, :b.shape[1]].set(b)

    # fused head matrix: mu -> output lanes [0,32), logvar -> output lanes [64,96)
    w_head = jnp.zeros((LANE, LANE), jnp.float32)
    w_head = w_head.at[:NUM_NEURONS, MU_OFF:MU_OFF + LATENT_D].set(wmu_f)
    w_head = w_head.at[:NUM_NEURONS, EPS_OFF:EPS_OFF + LATENT_D].set(wlv_f)
    b_head = jnp.zeros((1, LANE), jnp.float32)
    b_head = b_head.at[:, MU_OFF:MU_OFF + LATENT_D].set(bmu_f)
    b_head = b_head.at[:, EPS_OFF:EPS_OFF + LATENT_D].set(blv_f)

    # decoder Linear1 with rows duplicated: rows [0,32) take the mu part of v,
    # rows [64,96) take the softplus(lv)*eps part -> v @ w_d1 == z @ dw1 exactly.
    w_d1 = jnp.zeros((LANE, LANE), jnp.float32)
    w_d1 = w_d1.at[MU_OFF:MU_OFF + LATENT_D, :NUM_NEURONS].set(dw1)
    w_d1 = w_d1.at[EPS_OFF:EPS_OFF + LATENT_D, :NUM_NEURONS].set(dw1)

    # final decoder layer: permute columns to COMPONENT-MAJOR (new lane = c*21 + j)
    perm = np.arange(N_REC6D).reshape(N_JOINTS, 6).T.reshape(-1)
    dw3_cm = dw3[:, perm]
    db3_cm = db3[:, perm]

    w_slab = jnp.concatenate(
        [padw(w1f), w_head, w_d1, padw(dw2), padw(dw3_cm)], axis=0)          # (640, 128)
    b_slab = jnp.concatenate(
        [padb(b1f), b_head, padb(db1), padb(db2), padb(db3_cm),
         jnp.zeros((3, LANE), jnp.float32)], axis=0)                          # (8, 128)
    return w_slab.astype(jnp.bfloat16), b_slab


# ---------------- wrapper ----------------

def _choose_tile_b(B):
    """Batch tile: multiple of 16 (bf16 sublanes), large, and >=2 grid steps for big B."""
    Bp = _round_up(B, 16)
    if Bp <= 512:
        return Bp                                        # single tile, small batch
    if Bp <= 2048:
        return _round_up((Bp + 1) // 2, 16)              # 2 steps -> both v7x TensorCores
    return 1024


def vposer_prior_forward(poses, eps, w_slab, b_slab):
    """poses: (B, >=63) body poses; eps: (B, LATENT_D) sampling noise. Returns scalar loss."""
    B = poses.shape[0]
    poses_body = poses[..., :N_DIMS].reshape(-1, N_DIMS).astype(jnp.float32)

    tile_b = _choose_tile_b(B)
    Bp = _round_up(B, tile_b)

    # single streamed slab (bf16): pose in lanes [0,63), eps in lanes [64,96), rest zero.
    # TODO(synk): the pad still materializes one (Bp,128) bf16 copy in HBM; could be removed
    #             with CompilerParams(allow_input_fusion) once that path is validated.
    x_slab = jnp.zeros((Bp, LANE), jnp.bfloat16)
    x_slab = x_slab.at[:B, :N_DIMS].set(poses_body.astype(jnp.bfloat16))
    x_slab = x_slab.at[:B, EPS_OFF:EPS_OFF + LATENT_D].set(eps.astype(jnp.bfloat16))

    rec = vposer_mlp(x_slab, w_slab, b_slab, tile_b)[:B]     # (B,128) f32, component-major

    # decode(...)['pose_body']: rot6d -> rotmat -> axis-angle on (B,21) component planes
    planes = [rec[:, c * N_JOINTS:(c + 1) * N_JOINTS] for c in range(6)]
    ax, ay, az = _axis_angle_from_planes(*planes)

    # AnyReg 'l2' loss: sum of squared diffs over dims, mean over rows.
    p = poses_body.reshape(B, N_JOINTS, 3)
    dx = p[:, :, 0] - ax
    dy = p[:, :, 1] - ay
    dz = p[:, :, 2] - az
    return (jnp.sum(dx * dx) + jnp.sum(dy * dy) + jnp.sum(dz * dz)) / B


if __name__ == "__main__":
    key = jax.random.PRNGKey(0)
    kp, ke, kw = jax.random.split(key, 3)

    B = 128                                              # frames; rows feed the MXU directly
    poses = 0.3 * jax.random.normal(kp, (B, 72), jnp.float32)   # SMPL-style; only [:63] used
    eps = jax.random.normal(ke, (B, LATENT_D), jnp.float32)     # noise for latent.sample()

    params = init_params(kw)
    w_slab, b_slab = pack_params(params)                 # one-time fold + pack (2 DMA slabs)

    loss = jax.jit(vposer_prior_forward)(poses, eps, w_slab, b_slab)
    loss = jax.block_until_ready(loss)
    assert loss.shape == () and bool(jnp.isfinite(loss))
    print("KERNEL_OK")
</pallas_src>

<mosaic_0001>
module attributes {stable_mosaic.version = 11 : i64} {
  func.func @vposer_mlp_kernel(%arg0: i32, %arg1: memref<128x128xbf16, #tpu.memory_space<vmem>>, %arg2: memref<640x128xbf16, #tpu.memory_space<vmem>>, %arg3: memref<8x128xf32, #tpu.memory_space<vmem>>, %arg4: memref<128x128xf32, #tpu.memory_space<vmem>>) attributes {dimension_semantics = [#tpu.dimension_semantics<parallel>], iteration_bounds = array<i64: 1>, scalar_prefetch = 0 : i64, scratch_operands = 0 : i64, tpu.core_type = #tpu.core_type<tc>, window_params = [{transform_indices = @transform_0, window_bounds = array<i64: 128, 128>}, {pipeline_mode = #tpu.pipeline_mode<synchronous>, transform_indices = @transform_1, window_bounds = array<i64: 640, 128>}, {pipeline_mode = #tpu.pipeline_mode<synchronous>, transform_indices = @transform_2, window_bounds = array<i64: 8, 128>}, {transform_indices = @transform_3, window_bounds = array<i64: 128, 128>}]} {
    %c0 = arith.constant 0 : index
    %c0_0 = arith.constant 0 : index
    %0 = vector.load %arg1[%c0, %c0_0] : memref<128x128xbf16, #tpu.memory_space<vmem>>, vector<128x128xbf16>
    %c0_1 = arith.constant 0 : index
    %c0_2 = arith.constant 0 : index
    %1 = vector.load %arg2[%c0_1, %c0_2] : memref<640x128xbf16, #tpu.memory_space<vmem>>, vector<128x128xbf16>
    %cst = arith.constant dense<0.000000e+00> : vector<128x128xf32>
    %2 = tpu.matmul %0, %1, %cst {dimension_numbers = #tpu.dot_dimension_numbers<[1], [0], [0], [1], [0, 0, 1, 1], [], []>} : vector<128x128xbf16>, vector<128x128xbf16>, vector<128x128xf32> -> vector<128x128xf32>
    %c0_3 = arith.constant 0 : index
    %c0_4 = arith.constant 0 : index
    %3 = vector.load %arg3[%c0_3, %c0_4] : memref<8x128xf32, #tpu.memory_space<vmem>>, vector<1x128xf32>
    %4 = vector.broadcast %3 : vector<1x128xf32> to vector<128x128xf32>
    %5 = arith.addf %2, %4 : vector<128x128xf32>
    %cst_5 = arith.constant 0.000000e+00 : f32
    %6 = vector.broadcast %cst_5 : f32 to vector<128x128xf32>
    %7 = arith.cmpf ogt, %5, %6 : vector<128x128xf32>
    %cst_6 = arith.constant 0.00999999977 : f32
    %8 = vector.broadcast %cst_6 : f32 to vector<128x128xf32>
    %9 = arith.mulf %8, %5 : vector<128x128xf32>
    %10 = arith.select %7, %5, %9 : vector<128x128xi1>, vector<128x128xf32>
    %11 = arith.truncf %10 : vector<128x128xf32> to vector<128x128xbf16>
    %c128 = arith.constant 128 : index
    %c0_7 = arith.constant 0 : index
    %12 = vector.load %arg2[%c128, %c0_7] : memref<640x128xbf16, #tpu.memory_space<vmem>>, vector<128x128xbf16>
    %cst_8 = arith.constant dense<0.000000e+00> : vector<128x128xf32>
    %13 = tpu.matmul %11, %12, %cst_8 {dimension_numbers = #tpu.dot_dimension_numbers<[1], [0], [0], [1], [0, 0, 1, 1], [], []>} : vector<128x128xbf16>, vector<128x128xbf16>, vector<128x128xf32> -> vector<128x128xf32>
    %c1 = arith.constant 1 : index
    %c0_9 = arith.constant 0 : index
    %14 = vector.load %arg3[%c1, %c0_9] : memref<8x128xf32, #tpu.memory_space<vmem>>, vector<1x128xf32>
    %15 = vector.broadcast %14 : vector<1x128xf32> to vector<128x128xf32>
    %16 = arith.addf %13, %15 : vector<128x128xf32>
    %17 = tpu.iota {dimensions = array<i32: 1>} : vector<128x128xi32>
    %c32_i32 = arith.constant 32 : i32
    %18 = vector.broadcast %c32_i32 : i32 to vector<128x128xi32>
    %19 = arith.cmpi slt, %17, %18 : vector<128x128xi32>
    %cst_10 = arith.constant 0.000000e+00 : f32
    %20 = vector.broadcast %cst_10 : f32 to vector<128x128xf32>
    %21 = arith.select %19, %16, %20 : vector<128x128xi1>, vector<128x128xf32>
    %c64_i32 = arith.constant 64 : i32
    %22 = vector.broadcast %c64_i32 : i32 to vector<128x128xi32>
    %23 = arith.cmpi sge, %17, %22 : vector<128x128xi32>
    %c96_i32 = arith.constant 96 : i32
    %24 = vector.broadcast %c96_i32 : i32 to vector<128x128xi32>
    %25 = arith.cmpi slt, %17, %24 : vector<128x128xi32>
    %26 = arith.andi %23, %25 : vector<128x128xi1>
    %27 = arith.extf %0 : vector<128x128xbf16> to vector<128x128xf32>
    %cst_11 = arith.constant 0.000000e+00 : f32
    %28 = vector.broadcast %cst_11 : f32 to vector<128x128xf32>
    %29 = arith.select %26, %27, %28 : vector<128x128xi1>, vector<128x128xf32>
    %cst_12 = arith.constant 0.000000e+00 : f32
    %30 = vector.broadcast %cst_12 : f32 to vector<128x128xf32>
    %31 = arith.maximumf %16, %30 : vector<128x128xf32>
    %32 = math.absf %16 : vector<128x128xf32>
    %cst_13 = arith.constant 0.000000e+00 : f32
    %33 = vector.broadcast %cst_13 : f32 to vector<128x128xf32>
    %34 = arith.subf %33, %32 : vector<128x128xf32>
    %35 = math.exp %34 : vector<128x128xf32>
    %36 = math.log1p %35 : vector<128x128xf32>
    %37 = arith.addf %31, %36 : vector<128x128xf32>
    %38 = arith.mulf %37, %29 : vector<128x128xf32>
    %39 = arith.addf %21, %38 : vector<128x128xf32>
    %40 = arith.truncf %39 : vector<128x128xf32> to vector<128x128xbf16>
    %c256 = arith.constant 256 : index
    %c0_14 = arith.constant 0 : index
    %41 = vector.load %arg2[%c256, %c0_14] : memref<640x128xbf16, #tpu.memory_space<vmem>>, vector<128x128xbf16>
    %cst_15 = arith.constant dense<0.000000e+00> : vector<128x128xf32>
    %42 = tpu.matmul %40, %41, %cst_15 {dimension_numbers = #tpu.dot_dimension_numbers<[1], [0], [0], [1], [0, 0, 1, 1], [], []>} : vector<128x128xbf16>, vector<128x128xbf16>, vector<128x128xf32> -> vector<128x128xf32>
    %c2 = arith.constant 2 : index
    %c0_16 = arith.constant 0 : index
    %43 = vector.load %arg3[%c2, %c0_16] : memref<8x128xf32, #tpu.memory_space<vmem>>, vector<1x128xf32>
    %44 = vector.broadcast %43 : vector<1x128xf32> to vector<128x128xf32>
    %45 = arith.addf %42, %44 : vector<128x128xf32>
    %cst_17 = arith.constant 0.000000e+00 : f32
    %46 = vector.broadcast %cst_17 : f32 to vector<128x128xf32>
    %47 = arith.cmpf ogt, %45, %46 : vector<128x128xf32>
    %cst_18 = arith.constant 0.00999999977 : f32
    %48 = vector.broadcast %cst_18 : f32 to vector<128x128xf32>
    %49 = arith.mulf %48, %45 : vector<128x128xf32>
    %50 = arith.select %47, %45, %49 : vector<128x128xi1>, vector<128x128xf32>
    %51 = arith.truncf %50 : vector<128x128xf32> to vector<128x128xbf16>
    %c384 = arith.constant 384 : index
    %c0_19 = arith.constant 0 : index
    %52 = vector.load %arg2[%c384, %c0_19] : memref<640x128xbf16, #tpu.memory_space<vmem>>, vector<128x128xbf16>
    %cst_20 = arith.constant dense<0.000000e+00> : vector<128x128xf32>
    %53 = tpu.matmul %51, %52, %cst_20 {dimension_numbers = #tpu.dot_dimension_numbers<[1], [0], [0], [1], [0, 0, 1, 1], [], []>} : vector<128x128xbf16>, vector<128x128xbf16>, vector<128x128xf32> -> vector<128x128xf32>
    %c3 = arith.constant 3 : index
    %c0_21 = arith.constant 0 : index
    %54 = vector.load %arg3[%c3, %c0_21] : memref<8x128xf32, #tpu.memory_space<vmem>>, vector<1x128xf32>
    %55 = vector.broadcast %54 : vector<1x128xf32> to vector<128x128xf32>
    %56 = arith.addf %53, %55 : vector<128x128xf32>
    %cst_22 = arith.constant 0.000000e+00 : f32
    %57 = vector.broadcast %cst_22 : f32 to vector<128x128xf32>
    %58 = arith.cmpf ogt, %56, %57 : vector<128x128xf32>
    %cst_23 = arith.constant 0.00999999977 : f32
    %59 = vector.broadcast %cst_23 : f32 to vector<128x128xf32>
    %60 = arith.mulf %59, %56 : vector<128x128xf32>
    %61 = arith.select %58, %56, %60 : vector<128x128xi1>, vector<128x128xf32>
    %62 = arith.truncf %61 : vector<128x128xf32> to vector<128x128xbf16>
    %c512 = arith.constant 512 : index
    %c0_24 = arith.constant 0 : index
    %63 = vector.load %arg2[%c512, %c0_24] : memref<640x128xbf16, #tpu.memory_space<vmem>>, vector<128x128xbf16>
    %cst_25 = arith.constant dense<0.000000e+00> : vector<128x128xf32>
    %64 = tpu.matmul %62, %63, %cst_25 {dimension_numbers = #tpu.dot_dimension_numbers<[1], [0], [0], [1], [0, 0, 1, 1], [], []>} : vector<128x128xbf16>, vector<128x128xbf16>, vector<128x128xf32> -> vector<128x128xf32>
    %c4 = arith.constant 4 : index
    %c0_26 = arith.constant 0 : index
    %65 = vector.load %arg3[%c4, %c0_26] : memref<8x128xf32, #tpu.memory_space<vmem>>, vector<1x128xf32>
    %66 = vector.broadcast %65 : vector<1x128xf32> to vector<128x128xf32>
    %67 = arith.addf %64, %66 : vector<128x128xf32>
    %c0_27 = arith.constant 0 : index
    %c0_28 = arith.constant 0 : index
    %68 = vector.load %arg4[%c0_27, %c0_28] : memref<128x128xf32, #tpu.memory_space<vmem>>, vector<128x128xf32>
    tpu.vector_store %arg4[%c0_27, %c0_28], %67 {strides = array<i32>} : memref<128x128xf32, #tpu.memory_space<vmem>>, vector<128x128xf32>,
    return
  }
  func.func @transform_0(%arg0: i32) -> (i32, i32) {
    %c0_i32 = arith.constant 0 : i32
    %c0_i32_0 = arith.constant 0 : i32
    return %arg0, %c0_i32 : i32, i32
  }
  func.func @transform_1(%arg0: i32) -> (i32, i32) {
    %c0_i32 = arith.constant 0 : i32
    %c0_i32_0 = arith.constant 0 : i32
    %c0_i32_1 = arith.constant 0 : i32
    return %c0_i32, %c0_i32_0 : i32, i32
  }
  func.func @transform_2(%arg0: i32) -> (i32, i32) {
    %c0_i32 = arith.constant 0 : i32
    %c0_i32_0 = arith.constant 0 : i32
    %c0_i32_1 = arith.constant 0 : i32
    return %c0_i32, %c0_i32_0 : i32, i32
  }
  func.func @transform_3(%arg0: i32) -> (i32, i32) {
    %c0_i32 = arith.constant 0 : i32
    %c0_i32_0 = arith.constant 0 : i32
    return %arg0, %c0_i32 : i32, i32
  }
}

</mosaic_0001>

<bundles_post_ra>
// kernel: vposer_prior_forward.1
= control target key start
LH: loop header
LB: loop body
LE: loop exit
PB: predicated region body
PF: predicated region fallthrough
CT: control target
= control target key end

     0   :  { %s2605_s1 = inlined_call_operand.vmem [shape: bf16[640,128], index: 1, kind: input, shape index: {}]   ;;  %s2606_s0 = inlined_call_operand.vmem [shape: bf16[128,128], index: 0, kind: input, shape index: {}]   ;;  %s2607_s2 = inlined_call_operand.vmem [shape: f32[8,128], index: 2, kind: input, shape index: {}]   ;;  %s2608_s3 = inlined_call_operand.vmem [shape: f32[128,128], index: 3, kind: output, shape index: {}]  }
   0x1   :  { %v1740_v0 = vld [vmem:[%s2605_s1 + $0x38] sm:$0xff]   ;;  %v1741_v1 = vld [vmem:[%s2605_s1 + $0x30] sm:$0xff]   ;;  %v1742_v2 = vld [vmem:[%s2605_s1 + $0x28] sm:$0xff]  }
   0x2   :  { %1564 = vmatprep.subr.bf16.mxu0 %v1740_v0  ;;  %v1743_v3 = vld [vmem:[%s2605_s1 + $0x20] sm:$0xff]   ;;  %v1744_v5 = vld [vmem:[%s2605_s1 + $0x18] sm:$0xff]   ;;  %v1757_v7 = vld [vmem:[%s2605_s1 + $0x70] sm:$0xff]  }
   0x3   :  { %1565 = vmatpush3.bf16.msra.mxu0 %v1740_v0  ;;  %v1896_v4 = vld [vmem:[%s2606_s0] sm:$0xff]   ;;  %v1756_v6 = vld [vmem:[%s2605_s1 + $0x78] sm:$0xff]   ;;  %v1745_v8 = vld [vmem:[%s2605_s1 + $0x10] sm:$0xff]  }
   0x4   :  { %1566 = vmatprep.subr.bf16.mxu0 %v1741_v1  ;;  %1580 = vmatprep.mubr.bf16.mxu0 %v1896_v4  ;;  %v1758_v9 = vld [vmem:[%s2605_s1 + $0x68] sm:$0xff]   ;;  %v1759_v11 = vld [vmem:[%s2605_s1 + $0x60] sm:$0xff]   ;;  %v1760_v13 = vld [vmem:[%s2605_s1 + $0x58] sm:$0xff]  }
   0x5   :  { %1596 = vmatprep.subr.bf16.mxu1 %v1756_v6  ;;  %v1746_v10 = vld [vmem:[%s2605_s1 + $0x8] sm:$0xff]   ;;  %v1747_v12 = vld [vmem:[%s2605_s1] sm:$0xff]   ;;  %v1934_v15 = vld [vmem:[%s2606_s0 + $0x10] sm:$0xff]  }
   0x6   :  { %1597 = vmatpush3.bf16.msra.mxu1 %v1756_v6  ;;  %v1929_v14 = vld [vmem:[%s2606_s0 + $0x8] sm:$0xff]   ;;  %v1939_v16 = vld [vmem:[%s2606_s0 + $0x18] sm:$0xff]   ;;  %v1946_v17 = vld [vmem:[%s2606_s0 + $0x20] sm:$0xff]  }
   0x7   :  { %1567 = vmatpush3.bf16.msra.mxu0 %v1741_v1  ;;  %1598 = vmatprep.subr.bf16.mxu1 %v1757_v7  ;;  %v1953_v18 = vld [vmem:[%s2606_s0 + $0x28] sm:$0xff]   ;;  %v1958_v19 = vld [vmem:[%s2606_s0 + $0x30] sm:$0xff]   ;;  %v1965_v20 = vld [vmem:[%s2606_s0 + $0x38] sm:$0xff]  }
   0x8   :  { %1568 = vmatprep.subr.bf16.mxu0 %v1742_v2  ;;  %2621 = vst [vmem:[#allocation2_spill] sm:$0xff] %v1953_v18  ;;  %2622 = vst [vmem:[#allocation3_spill] sm:$0xff] %v1958_v19  ;;  %v1761_v21 = vld [vmem:[%s2605_s1 + $0x50] sm:$0xff]   ;;  %v1762_v22 = vld [vmem:[%s2605_s1 + $0x48] sm:$0xff]  }
   0x9   :  { %2623 = vst [vmem:[#allocation4_spill] sm:$0xff] %v1965_v20  ;;  %v1763_v23 = vld [vmem:[%s2605_s1 + $0x40] sm:$0xff]  }
   0xa   :  { %1599 = vmatpush3.bf16.msra.mxu1 %v1757_v7  ;;  %v1980_v25 = vld [vmem:[%s2607_s2] ss:$0 sm:$0xff] }
   0xb   :  { %1569 = vmatpush3.bf16.msra.mxu0 %v1742_v2  ;;  %1600 = vmatprep.subr.bf16.mxu1 %v1758_v9 }
   0xc   :  { %1570 = vmatprep.subr.bf16.mxu0 %v1743_v3 }
   0xe   :  { %1601 = vmatpush3.bf16.msra.mxu1 %v1758_v9 }
   0xf   :  { %1571 = vmatpush3.bf16.msra.mxu0 %v1743_v3  ;;  %1602 = vmatprep.subr.bf16.mxu1 %v1759_v11 }
  0x10   :  { %1572 = vmatprep.subr.bf16.mxu0 %v1744_v5 }
  0x12   :  { %1603 = vmatpush3.bf16.msra.mxu1 %v1759_v11 }
  0x13   :  { %1573 = vmatpush3.bf16.msra.mxu0 %v1744_v5  ;;  %1604 = vmatprep.subr.bf16.mxu1 %v1760_v13 }
  0x14   :  { %1574 = vmatprep.subr.bf16.mxu0 %v1745_v8 }
  0x16   :  { %1605 = vmatpush3.bf16.msra.mxu1 %v1760_v13 }
  0x17   :  { %1575 = vmatpush3.bf16.msra.mxu0 %v1745_v8  ;;  %1606 = vmatprep.subr.bf16.mxu1 %v1761_v21 }
  0x18   :  { %1576 = vmatprep.subr.bf16.mxu0 %v1746_v10 }
  0x1a   :  { %1607 = vmatpush3.bf16.msra.mxu1 %v1761_v21 }
  0x1b   :  { %1577 = vmatpush3.bf16.msra.mxu0 %v1746_v10  ;;  %1608 = vmatprep.subr.bf16.mxu1 %v1762_v22 }
  0x1c   :  { %1578 = vmatprep.subr.bf16.mxu0 %v1747_v12 }
  0x1e   :  { %1609 = vmatpush3.bf16.msra.mxu1 %v1762_v22 }
  0x1f   :  { %1579 = vmatpush3.bf16.msra.mxu0 %v1747_v12  ;;  %1610 = vmatprep.subr.bf16.mxu1 %v1763_v23 }
  0x22   :  { %1581 = vmatmul.mubr.bf16.vlgmr.msra.gmra.mxu0 %v1929_v14  ;;  %1611 = vmatpush3.bf16.msra.mxu1 %v1763_v23 }
  0x23   :  { %1584 = vmatprep.mubr.bf16.mxu0 %v1934_v15 }
  0x2a   :  { %1585 = vmatmul.mubr.bf16.gmra.mxu0 %v1939_v16 }
  0x2b   :  { %1588 = vmatprep.mubr.bf16.mxu0 %v1946_v17 }
  0x32   :  { %1589 = vmatmul.mubr.bf16.gmra.mxu0 %v1953_v18 }
  0x33   :  { %1592 = vmatprep.mubr.bf16.mxu0 %v1958_v19 }
  0x3a   :  { %1593 = vmatmul.mubr.bf16.gmra.mxu0 %v1965_v20 }
  0xe2   :  { %v1582_v24 = vpop.f32.mrf.mxu0 }
  0xe3   :  { %v191_v28 = vadd.f32 %v1582_v24, %v1980_v25 }
  0xe4   :  { %v182_v26 = vpop.f32.mrf.mxu0 }
  0xe5   :  { %v183_v27 = vadd.f32 %v1980_v25, %v182_v26  ;;  %v263_v35 = vmul.f32 0.01, %v191_v28  ;;  %vm247_vm2 = vcmp.gt.f32.partialorder %v191_v28, 0.0 }
  0xe6   :  { %v1583_v29 = vpop.f32.mrf.mxu0 }
  0xe7   :  { %v194_v30 = vadd.f32 %v1583_v29, %v1980_v25  ;;  %v261_v32 = vmul.f32 0.01, %v183_v27  ;;  %vm245_vm1 = vcmp.gt.f32.partialorder %v183_v27, 0.0  ;;  %v279_v46 = vsel %vm247_vm2, %v191_v28, %v263_v35 }
  0xe8   :  { %v185_v31 = vpop.f32.mrf.mxu0 }
  0xe9   :  { %vm248_vm0 = vcmp.gt.f32.partialorder %v194_v30, 0.0  ;;  %v264_v33 = vmul.f32 0.01, %v194_v30  ;;  %v186_v34 = vadd.f32 %v1980_v25, %v185_v31  ;;  %v277_v41 = vsel %vm245_vm1, %v183_v27, %v261_v32 }
  0xea   :  { %v1586_v36 = vpop.f32.mrf.mxu0 }
  0xeb   :  { %v262_v37 = vmul.f32 0.01, %v186_v34  ;;  %vm246_vm3 = vcmp.gt.f32.partialorder %v186_v34, 0.0  ;;  %v280_v39 = vsel %vm248_vm0, %v194_v30, %v264_v33  ;;  %v207_v43 = vadd.f32 %v1586_v36, %v1980_v25 }
  0xec   :  { %v198_v38 = vpop.f32.mrf.mxu0  ;;  %v294_v48 = vpack.c.bf16 %v280_v39, %v279_v46  ;;  %v1769_v46 = vld [vmem:[%s2605_s1 + $0x90] sm:$0xff]  }
  0xed   :  { %v199_v40 = vadd.f32 %v1980_v25, %v198_v38  ;;  %v278_v42 = vsel %vm246_vm3, %v186_v34, %v262_v37  ;;  %v267_v53 = vmul.f32 0.01, %v207_v43  ;;  %vm251_vm6 = vcmp.gt.f32.partialorder %v207_v43, 0.0 }
  0xee   :  { %v1587_v44 = vpop.f32.mrf.mxu0  ;;  %v293_v45 = vpack.c.bf16 %v278_v42, %v277_v41  ;;  %v1764_v42 = vld [vmem:[%s2605_s1 + $0xb8] sm:$0xff]  }
  0xef   :  { %v210_v47 = vadd.f32 %v1587_v44, %v1980_v25  ;;  %v265_v50 = vmul.f32 0.01, %v199_v40  ;;  %vm249_vm5 = vcmp.gt.f32.partialorder %v199_v40, 0.0  ;;  %v283_v0 = vsel %vm251_vm6, %v207_v43, %v267_v53  ;;  %1628 = vmatprep.subr.bf16.mxu0 %v1764_v42  ;;  %v1766_v43 = vld [vmem:[%s2605_s1 + $0xa8] sm:$0xff]   ;;  %v1767_v44 = vld [vmem:[%s2605_s1 + $0xa0] sm:$0xff]   ;;  %v1776_v53 = vld [vmem:[%s2605_s1 + $0xd8] sm:$0xff]  }
  0xf0   :  { %v201_v49 = vpop.f32.mrf.mxu0  ;;  %1612 = vmatprep.mubr.bf16.mxu1 %v293_v45  ;;  %1629 = vmatpush3.bf16.msra.mxu0 %v1764_v42  ;;  %v1768_v45 = vld [vmem:[%s2605_s1 + $0x98] sm:$0xff]  }
  0xf1   :  { %vm252_vm4 = vcmp.gt.f32.partialorder %v210_v47, 0.0  ;;  %v268_v51 = vmul.f32 0.01, %v210_v47  ;;  %v202_v52 = vadd.f32 %v1980_v25, %v201_v49  ;;  %1613 = vmatmul.mubr.bf16.vlgmr.msra.gmra.mxu1 %v294_v48  ;;  %v281_v59 = vsel %vm249_vm5, %v199_v40, %v265_v50  ;;  %v1771_v48 = vld [vmem:[%s2605_s1 + $0x80] sm:$0xff]   ;;  %v1772_v49 = vld [vmem:[%s2605_s1 + $0xf8] sm:$0xff]   ;;  %v1773_v50 = vld [vmem:[%s2605_s1 + $0xf0] sm:$0xff]  }
  0xf2   :  { %v1590_v54 = vpop.f32.mrf.mxu0  ;;  %1660 = vmatprep.subr.bf16.mxu1 %v1772_v49 }
  0xf3   :  { %vm250_vm7 = vcmp.gt.f32.partialorder %v202_v52, 0.0  ;;  %v266_v55 = vmul.f32 0.01, %v202_v52  ;;  %v284_v57 = vsel %vm252_vm4, %v210_v47, %v268_v51  ;;  %v223_v61 = vadd.f32 %v1590_v54, %v1980_v25  ;;  %v1770_v47 = vld [vmem:[%s2605_s1 + $0x88] sm:$0xff]   ;;  %1661 = vmatpush3.bf16.msra.mxu1 %v1772_v49  ;;  %v2040_v54 = vld [vmem:[%s2607_s2 + $0x1] ss:$0 sm:$0xff] }
  0xf4   :  { %v214_v56 = vpop.f32.mrf.mxu0  ;;  %v296_v2 = vpack.c.bf16 %v284_v57, %v283_v0  ;;  %1662 = vmatprep.subr.bf16.mxu1 %v1773_v50  ;;  %v1774_v51 = vld [vmem:[%s2605_s1 + $0xe8] sm:$0xff]   ;;  %v493_v49 = vunpack.c.l.bf16 %v1934_v15 }
  0xf5   :  { %v215_v58 = vadd.f32 %v1980_v25, %v214_v56  ;;  %v282_v60 = vsel %vm250_vm7, %v202_v52, %v266_v55  ;;  %v271_v8 = vmul.f32 0.01, %v223_v61  ;;  %vm255_vm10 = vcmp.gt.f32.partialorder %v223_v61, 0.0  ;;  %v1775_v52 = vld [vmem:[%s2605_s1 + $0xe0] sm:$0xff]  }
  0xf6   :  { %v1591_v62 = vpop.f32.mrf.mxu0  ;;  %v295_v63 = vpack.c.bf16 %v282_v60, %v281_v59 }
  0xf7   :  { %v226_v1 = vadd.f32 %v1591_v62, %v1980_v25  ;;  %v269_v5 = vmul.f32 0.01, %v215_v58  ;;  %vm253_vm9 = vcmp.gt.f32.partialorder %v215_v58, 0.0  ;;  %v287_v27 = vsel %vm255_vm10, %v223_v61, %v271_v8  ;;  %1663 = vmatpush3.bf16.msra.mxu1 %v1773_v50 }
  0xf8   :  { %v217_v3 = vpop.f32.mrf.mxu0  ;;  %1616 = vmatprep.mubr.bf16.mxu1 %v295_v63  ;;  %1664 = vmatprep.subr.bf16.mxu1 %v1774_v51  ;;  %v467_v8 = vlaneseq }
  0xf9   :  { %vm256_vm8 = vcmp.gt.f32.partialorder %v226_v1, 0.0  ;;  %v272_v6 = vmul.f32 0.01, %v226_v1  ;;  %v218_v7 = vadd.f32 %v1980_v25, %v217_v3  ;;  %1617 = vmatmul.mubr.bf16.gmra.mxu1 %v296_v2  ;;  %v285_v21 = vsel %vm253_vm9, %v215_v58, %v269_v5 }
  0xfa   :  { %v1594_v9 = vpop.f32.mrf.mxu0 }
  0xfb   :  { %vm254_vm11 = vcmp.gt.f32.partialorder %v218_v7, 0.0  ;;  %v270_v10 = vmul.f32 0.01, %v218_v7  ;;  %v288_v12 = vsel %vm256_vm8, %v226_v1, %v272_v6  ;;  %v239_v23 = vadd.f32 %v1594_v9, %v1980_v25  ;;  %1665 = vmatpush3.bf16.msra.mxu1 %v1774_v51 }
  0xfc   :  { %v230_v11 = vpop.f32.mrf.mxu0  ;;  %v298_v29 = vpack.c.bf16 %v288_v12, %v287_v27  ;;  %1666 = vmatprep.subr.bf16.mxu1 %v1775_v52  ;;  %v2066_v27 = vand.u32 127, %v467_v8  ;;  %v498_v8 = vunpack.c.h.bf16 %v1946_v17 }
  0xfd   :  { %v231_v13 = vadd.f32 %v1980_v25, %v230_v11  ;;  %v286_v22 = vsel %vm254_vm11, %v218_v7, %v270_v10  ;;  %v275_v34 = vmul.f32 0.01, %v239_v23  ;;  %vm259_vm14 = vcmp.gt.f32.partialorder %v239_v23, 0.0 }
  0xfe   :  { %v1595_v24 = vpop.f32.mrf.mxu0  ;;  %v297_v26 = vpack.c.bf16 %v286_v22, %v285_v21  ;;  %2624 = vst [vmem:[#allocation5_spill] sm:$0xff] %v2066_v27  ;;  %vm486_vm0 = vcmp.ge.s32.totalorder %v2066_v27, 64  ;;  %vm487_vm1 = vcmp.lt.s32.totalorder %v2066_v27, 96  ;;  %vm469_vm3 = vcmp.lt.s32.totalorder %v2066_v27, 32 }
  0xff   :  { %v242_v28 = vadd.f32 %v1595_v24, %v1980_v25  ;;  %v273_v31 = vmul.f32 0.01, %v231_v13  ;;  %vm257_vm13 = vcmp.gt.f32.partialorder %v231_v13, 0.0  ;;  %v291_v40 = vsel %vm259_vm14, %v239_v23, %v275_v34  ;;  %1667 = vmatpush3.bf16.msra.mxu1 %v1775_v52  ;;  %vm2089_vm2 = vmand %vm486_vm0, %vm487_vm1 }
 0x100   :  { %v233_v30 = vpop.f32.mrf.mxu0  ;;  %1620 = vmatprep.mubr.bf16.mxu1 %v297_v26  ;;  %1668 = vmatprep.subr.bf16.mxu1 %v1776_v53 }
 0x101   :  { %vm260_vm12 = vcmp.gt.f32.partialorder %v242_v28, 0.0  ;;  %v276_v32 = vmul.f32 0.01, %v242_v28  ;;  %v234_v33 = vadd.f32 %v1980_v25, %v233_v30  ;;  %1621 = vmatmul.mubr.bf16.gmra.mxu1 %v298_v29  ;;  %v289_v37 = vsel %vm257_vm13, %v231_v13, %v273_v31  ;;  %v1765_v25 = vld [vmem:[%s2605_s1 + $0xb0] sm:$0xff]  }
 0x102   :  { %1630 = vmatprep.subr.bf16.mxu0 %v1765_v25 }
 0x103   :  { %vm258_vm15 = vcmp.gt.f32.partialorder %v234_v33, 0.0  ;;  %v274_v35 = vmul.f32 0.01, %v234_v33  ;;  %v292_v36 = vsel %vm260_vm12, %v242_v28, %v276_v32  ;;  %1631 = vmatpush3.bf16.msra.mxu0 %v1765_v25  ;;  %1669 = vmatpush3.bf16.msra.mxu1 %v1776_v53 }
 0x104   :  { %v300_v41 = vpack.c.bf16 %v292_v36, %v291_v40  ;;  %1632 = vmatprep.subr.bf16.mxu0 %v1766_v43  ;;  %v489_v36 = vunpack.c.l.bf16 %v1896_v4 }
 0x105   :  { %v290_v38 = vsel %vm258_vm15, %v234_v33, %v274_v35 }
 0x106   :  { %v299_v39 = vpack.c.bf16 %v290_v38, %v289_v37 }
 0x107   :  { %1633 = vmatpush3.bf16.msra.mxu0 %v1766_v43  ;;  %v491_v43 = vunpack.c.l.bf16 %v1929_v14 }
 0x108   :  { %1624 = vmatprep.mubr.bf16.mxu1 %v299_v39  ;;  %1634 = vmatprep.subr.bf16.mxu0 %v1767_v44  ;;  %v490_v39 = vunpack.c.h.bf16 %v1896_v4  ;;  %v492_v4 = vunpack.c.h.bf16 %v1929_v14 }
 0x109   :  { %1625 = vmatmul.mubr.bf16.gmra.mxu1 %v300_v41 }
 0x10a   :  { %v2104_v52 = vsel %vm2089_vm2, %v490_v39, 0.0 }
 0x10b   :  { %1635 = vmatpush3.bf16.msra.mxu0 %v1767_v44 }
 0x10c   :  { %1636 = vmatprep.subr.bf16.mxu0 %v1768_v45 }
 0x10f   :  { %1637 = vmatpush3.bf16.msra.mxu0 %v1768_v45  ;;  %v2625_v45 = vmov 0 }
 0x110   :  { %1638 = vmatprep.subr.bf16.mxu0 %v1769_v46  ;;  %v2626_v45 = vsel %vm2089_vm2, 4294967295, %v2625_v45 }
 0x111   :  { %2627 = vst [vmem:[#allocation6_spill] sm:$0xff] %v2626_v45 }
 0x113   :  { %1639 = vmatpush3.bf16.msra.mxu0 %v1769_v46 }
 0x114   :  { %1640 = vmatprep.subr.bf16.mxu0 %v1770_v47 }
 0x117   :  { %1641 = vmatpush3.bf16.msra.mxu0 %v1770_v47 }
 0x118   :  { %1642 = vmatprep.subr.bf16.mxu0 %v1771_v48 }
 0x11b   :  { %1643 = vmatpush3.bf16.msra.mxu0 %v1771_v48  ;;  %v2096_v48 = vsel %vm2089_vm2, %v489_v36, 0.0 }
 0x1b1   :  { %v1614_v55 = vpop.f32.mrf.mxu1 }
 0x1b2   :  { %v2043_v56 = vadd.f32 %v1614_v55, %v2040_v54 }
 0x1b3   :  { %v404_v57 = vpop.f32.mrf.mxu1 }
 0x1b4   :  { %v539_v58 = vand.u32 2147483647, %v2043_v56  ;;  %v2047_v59 = vadd.f32 %v2040_v54, %v404_v57  ;;  %v2109_v57 = vsel %vm2089_vm2, %v491_v43, 0.0  ;;  %v2167_v36 = vsel %vm469_vm3, %v2043_v56, 0.0 }
 0x1b5   :  { %v1615_v60 = vpop.f32.mrf.mxu1 }
 0x1b6   :  { %v555_v61 = vsub.f32 0.0, %v539_v58  ;;  %v537_v62 = vand.u32 2147483647, %v2047_v59  ;;  %v2051_v63 = vadd.f32 %v1615_v60, %v2040_v54  ;;  %v494_v58 = vunpack.c.h.bf16 %v1934_v15 }
 0x1b7   :  { %v407_v0 = vpop.f32.mrf.mxu1 }
 0x1b8   :  { %v573_v1 = vmul.f32 1.442695, %v555_v61  ;;  %v553_v2 = vsub.f32 0.0, %v537_v62  ;;  %v2054_v3 = vadd.f32 %v2040_v54, %v407_v0  ;;  %v540_v5 = vand.u32 2147483647, %v2051_v63 }
 0x1b9   :  { %v1618_v6 = vpop.f32.mrf.mxu1  ;;  %v2117_v0 = vsel %vm2089_vm2, %v492_v4, 0.0 }
 0x1ba   :  { %1796 = vpow2.f32 %v573_v1  ;;  %v569_v7 = vmul.f32 1.442695, %v553_v2  ;;  %v556_v9 = vsub.f32 0.0, %v540_v5  ;;  %v538_v10 = vand.u32 2147483647, %v2054_v3 }
 0x1bb   :  { %v2059_v11 = vadd.f32 %v1618_v6, %v2040_v54  ;;  %v420_v12 = vpop.f32.mrf.mxu1  ;;  %v495_v1 = vunpack.c.l.bf16 %v1939_v16  ;;  %v496_v5 = vunpack.c.h.bf16 %v1939_v16  ;;  %v497_v6 = vunpack.c.l.bf16 %v1946_v17 }
 0x1bc   :  { %1798 = vpow2.f32 %v569_v7  ;;  %v2062_v13 = vadd.f32 %v2040_v54, %v420_v12  ;;  %v575_v21 = vmul.f32 1.442695, %v556_v9  ;;  %v554_v22 = vsub.f32 0.0, %v538_v10 }
 0x1bd   :  { %v1619_v23 = vpop.f32.mrf.mxu1  ;;  %v543_v24 = vand.u32 2147483647, %v2059_v11  ;;  %v500_v9 = vunpack.c.h.bf16 %v1953_v18  ;;  %v2136_v16 = vsel %vm2089_vm2, %v494_v58, 0.0  ;;  %v2141_v17 = vsel %vm2089_vm2, %v495_v1, 0.0 }
 0x1be   :  { %v541_v26 = vand.u32 2147483647, %v2062_v13  ;;  %1800 = vpow2.f32 %v575_v21  ;;  %v571_v28 = vmul.f32 1.442695, %v554_v22  ;;  %v2069_v29 = vadd.f32 %v1619_v23, %v2040_v54 }
 0x1bf   :  { %v423_v30 = vpop.f32.mrf.mxu1  ;;  %v559_v31 = vsub.f32 0.0, %v543_v24  ;;  %v2132_v21 = vsel %vm2089_vm2, %v493_v49, 0.0  ;;  %v2206_v1 = vsel %vm469_vm3, %v2062_v13, 0.0 }
 0x1c0   :  { %v557_v32 = vsub.f32 0.0, %v541_v26  ;;  %v2072_v33 = vadd.f32 %v2040_v54, %v423_v30  ;;  %1802 = vpow2.f32 %v571_v28  ;;  %v544_v34 = vand.u32 2147483647, %v2069_v29 }
 0x1c1   :  { %v1622_v35 = vpop.f32.mrf.mxu1  ;;  %v581_v37 = vmul.f32 1.442695, %v559_v31  ;;  %v2149_v28 = vsel %vm2089_vm2, %v496_v5, 0.0  ;;  %v2153_v30 = vsel %vm2089_vm2, %v497_v6, 0.0  ;;  %v2212_v5 = vsel %vm469_vm3, %v2069_v29, 0.0 }
 0x1c2   :  { %v577_v38 = vmul.f32 1.442695, %v557_v32  ;;  %v560_v40 = vsub.f32 0.0, %v544_v34  ;;  %v542_v41 = vand.u32 2147483647, %v2072_v33  ;;  %v2081_v42 = vadd.f32 %v1622_v35, %v2040_v54  ;;  %2629 = vst [vmem:[#allocation8_spill] sm:$0xff] %v2153_v30 }
 0x1c3   :  { %v436_v25 = vpop.f32.mrf.mxu1  ;;  %1804 = vpow2.f32 %v581_v37  ;;  %v2158_v34 = vsel %vm2089_vm2, %v498_v8, 0.0  ;;  %v2162_v35 = vsel %vm2089_vm2, %v500_v9, 0.0  ;;  %2633 = vst [vmem:[#allocation12_spill] sm:$0xff] %v2212_v5 }
 0x1c4   :  { %v2085_v44 = vadd.f32 %v2040_v54, %v436_v25  ;;  %1806 = vpow2.f32 %v577_v38  ;;  %v583_v46 = vmul.f32 1.442695, %v560_v40  ;;  %v558_v47 = vsub.f32 0.0, %v542_v41  ;;  %2630 = vst [vmem:[#allocation9_spill] sm:$0xff] %v2158_v34  ;;  %2631 = vst [vmem:[#allocation10_spill] sm:$0xff] %v2162_v35 }
 0x1c5   :  { %v547_v50 = vand.u32 2147483647, %v2081_v42  ;;  %v1623_v55 = vpop.f32.mrf.mxu1  ;;  %v2173_v38 = vsel %vm469_vm3, %v2047_v59, 0.0  ;;  %v2182_v25 = vsel %vm469_vm3, %v2051_v63, 0.0 }
 0x1c6   :  { %1808 = vpow2.f32 %v583_v46  ;;  %v579_v53 = vmul.f32 1.442695, %v558_v47  ;;  %v545_v14 = vand.u32 2147483647, %v2085_v44  ;;  %v2124_v15 = vadd.f32 %v1623_v55, %v2040_v54 }
 0x1c7   :  { %v2100_v51 = vpop.eup %1796  ;;  %v563_v61 = vsub.f32 0.0, %v547_v50  ;;  %v439_v32 = vpop.f32.mrf.mxu1  ;;  %v2193_v47 = vsel %vm469_vm3, %v2054_v3, 0.0 }
 0x1c8   :  { %v619_v60 = vadd.f32 1.0, %v2100_v51  ;;  %1810 = vpow2.f32 %v579_v53  ;;  %v561_v2 = vsub.f32 0.0, %v545_v14  ;;  %2628 = vst [vmem:[#allocation7_spill] sm:$0xff] %v2124_v15  ;;  %v548_v31 = vand.u32 2147483647, %v2124_v15 }
 0x1c9   :  { %v2113_v62 = vpop.eup %1798  ;;  %v589_v10 = vmul.f32 1.442695, %v563_v61  ;;  %v2186_v4 = vadd.f32 %v2040_v54, %v439_v32  ;;  %v622_v14 = vmul.f32 -0.5, %v2100_v51  ;;  %v625_v6 = vand.u32 2147483647, %v2100_v51  ;;  %v1626_v30 = vpop.f32.mrf.mxu1 }
 0x1ca   :  { %v601_v7 = vadd.f32 1.0, %v2113_v62  ;;  %1812 = vlog2.f32 %v619_v60  ;;  %v585_v22 = vmul.f32 1.442695, %v561_v2  ;;  %v564_v53 = vsub.f32 0.0, %v548_v31 }
 0x1cb   :  { %v2128_v12 = vpop.eup %1800  ;;  %2632 = vst [vmem:[#allocation11_spill] sm:$0xff] %v2186_v4  ;;  %v604_v55 = vmul.f32 -0.5, %v2113_v62  ;;  %v546_v8 = vand.u32 2147483647, %v2186_v4  ;;  %v623_v32 = vadd.f32 1.0, %v622_v14  ;;  %v2265_v45 = vadd.f32 %v1626_v30, %v2040_v54  ;;  %v452_v27 = vpop.f32.mrf.mxu1 }
 0x1cc   :  { %1814 = vlog2.f32 %v601_v7  ;;  %v628_v24 = vadd.f32 1.0, %v2128_v12  ;;  %v591_v31 = vmul.f32 1.442695, %v564_v53  ;;  %v631_v7 = vmul.f32 -0.5, %v2128_v12 }
 0x1cd   :  { %v2145_v26 = vpop.eup %1802  ;;  %1816 = vpow2.f32 %v589_v10  ;;  %v607_v10 = vand.u32 2147483647, %v2113_v62  ;;  %v634_v50 = vand.u32 2147483647, %v2128_v12  ;;  %vm2230_vm4 = vcmp.lt.f32.partialorder %v625_v6, 0.0004427343 }
 0x1ce   :  { %1818 = vlog2.f32 %v628_v24  ;;  %v610_v39 = vadd.f32 1.0, %v2145_v26  ;;  %v2224_v24 = vsel %vm469_vm3, %v2072_v33, 0.0  ;;  %v613_v2 = vmul.f32 -0.5, %v2145_v26 }
 0x1cf   :  { %1820 = vpow2.f32 %v585_v22  ;;  %v562_v53 = vsub.f32 0.0, %v546_v8  ;;  %vm2235_vm5 = vcmp.lt.f32.partialorder %v607_v10, 0.0004427343  ;;  %v616_v20 = vand.u32 2147483647, %v2145_v26 }
 0x1d0   :  { %v2176_v40 = vpop.eup %1804  ;;  %1822 = vlog2.f32 %v610_v39  ;;  %v605_v39 = vadd.f32 1.0, %v604_v55  ;;  %v632_v10 = vadd.f32 1.0, %v631_v7  ;;  %vm2246_vm6 = vcmp.lt.f32.partialorder %v634_v50, 0.0004427343 }
 0x1d1   :  { %v2188_v46 = vpop.eup %1806  ;;  %v655_v58 = vadd.f32 1.0, %v2176_v40  ;;  %v587_v43 = vmul.f32 1.442695, %v562_v53  ;;  %v614_v34 = vadd.f32 1.0, %v613_v2  ;;  %v661_v53 = vand.u32 2147483647, %v2176_v40 }
 0x1d2   :  { %v637_v60 = vadd.f32 1.0, %v2188_v46  ;;  %v640_v41 = vmul.f32 -0.5, %v2188_v46  ;;  %v606_v8 = vmul.f32 %v2113_v62, %v605_v39  ;;  %vm2259_vm7 = vcmp.lt.f32.partialorder %v616_v20, 0.0004427343 }
 0x1d3   :  { %v2201_v61 = vpop.eup %1808  ;;  %v2644_v30 = vmax.f32 %v2043_v56, 0.0  ;;  %vm2281_vm9 = vcmp.lt.f32.partialorder %v661_v53, 0.0004427343  ;;  %v1627_v53 = vpop.f32.mrf.mxu1 }
 0x1d4   :  { %1824 = vlog2.f32 %v637_v60  ;;  %v664_v22 = vadd.f32 1.0, %v2201_v61  ;;  %v641_v62 = vadd.f32 1.0, %v640_v41  ;;  %v670_v41 = vand.u32 2147483647, %v2201_v61 }
 0x1d5   :  { %v2217_v9 = vpop.eup %1810  ;;  %1826 = vlog2.f32 %v655_v58  ;;  %v658_v58 = vmul.f32 -0.5, %v2176_v40 }
 0x1d6   :  { %v646_v60 = vadd.f32 1.0, %v2217_v9  ;;  %1828 = vlog2.f32 %v664_v22  ;;  %v624_v22 = vmul.f32 %v2100_v51, %v623_v32  ;;  %v649_v51 = vmul.f32 -0.5, %v2217_v9 }
 0x1d7   :  { %v1813_v23 = vpop.eup %1812  ;;  %v659_v32 = vadd.f32 1.0, %v658_v58  ;;  %v633_v58 = vmul.f32 %v2128_v12, %v632_v10  ;;  %v652_v18 = vand.u32 2147483647, %v2217_v9  ;;  %v642_v10 = vmul.f32 %v2188_v46, %v641_v62 }
 0x1d8   :  { %1830 = vlog2.f32 %v646_v60  ;;  %v621_v6 = vmul.f32 0.6931472, %v1813_v23  ;;  %v667_v23 = vmul.f32 -0.5, %v2201_v61  ;;  %vm2291_vm10 = vcmp.lt.f32.partialorder %v670_v41, 0.0004427343 }
 0x1d9   :  { %v1815_v14 = vpop.eup %1814  ;;  %1832 = vpow2.f32 %v591_v31  ;;  %v643_v31 = vand.u32 2147483647, %v2188_v46  ;;  %v660_v12 = vmul.f32 %v2176_v40, %v659_v32  ;;  %vm2295_vm11 = vcmp.lt.f32.partialorder %v652_v18, 0.0004427343 }
 0x1da   :  { %v2241_v37 = vpop.eup %1816  ;;  %1834 = vpow2.f32 %v587_v43  ;;  %v627_v7 = vsel %vm2230_vm4, %v624_v22, %v621_v6  ;;  %v603_v2 = vmul.f32 0.6931472, %v1815_v14  ;;  %v615_v14 = vmul.f32 %v2145_v26, %v614_v34 }
 0x1db   :  { %v1819_v60 = vpop.eup %1818  ;;  %v691_v50 = vadd.f32 1.0, %v2241_v37  ;;  %vm2271_vm8 = vcmp.lt.f32.partialorder %v643_v31, 0.0004427343  ;;  %v668_v6 = vadd.f32 1.0, %v667_v23  ;;  %v650_v22 = vadd.f32 1.0, %v649_v51 }
 0x1dc   :  { %v2250_v35 = vpop.eup %1820  ;;  %v630_v43 = vmul.f32 0.6931472, %v1819_v60  ;;  %v747_v60 = vadd.f32 %v627_v7, %v2644_v30  ;;  %v609_v15 = vsel %vm2235_vm5, %v606_v8, %v603_v2  ;;  %v551_v34 = vand.u32 2147483647, %v2265_v45  ;;  %v455_v30 = vpop.f32.mrf.mxu1 }
 0x1dd   :  { %v673_v4 = vadd.f32 1.0, %v2250_v35  ;;  %v1823_v49 = vpop.eup %1822  ;;  %1836 = vlog2.f32 %v691_v50  ;;  %v2287_v31 = vadd.f32 %v2040_v54, %v452_v27  ;;  %v669_v51 = vmul.f32 %v2201_v61, %v668_v6 }
 0x1de   :  { %v636_v40 = vsel %vm2246_vm6, %v633_v58, %v630_v43  ;;  %v612_v23 = vmul.f32 0.6931472, %v1823_v49  ;;  %v651_v27 = vmul.f32 %v2217_v9, %v650_v22  ;;  %v567_v32 = vsub.f32 0.0, %v551_v34 }
 0x1df   :  { %1838 = vlog2.f32 %v673_v4  ;;  %v763_v19 = vmul.f32 %v747_v60, %v2109_v57  ;;  %v2651_v50 = vmax.f32 %v2047_v59, 0.0  ;;  %v694_v2 = vmul.f32 -0.5, %v2241_v37 }
 0x1e0   :  { %v697_v18 = vand.u32 2147483647, %v2241_v37  ;;  %v597_v41 = vmul.f32 1.442695, %v567_v32  ;;  %v549_v9 = vand.u32 2147483647, %v2287_v31  ;;  %v618_v49 = vsel %vm2259_vm7, %v615_v14, %v612_v23 }
 0x1e1   :  { %v1825_v5 = vpop.eup %1824  ;;  %v745_v7 = vadd.f32 %v609_v15, %v2651_v50  ;;  %v2315_v15 = vadd.f32 %v1627_v53, %v2040_v54  ;;  %v779_v34 = vadd.f32 %v763_v19, %v2167_v36  ;;  %v695_v14 = vadd.f32 1.0, %v694_v2 }
 0x1e2   :  { %v1827_v56 = vpop.eup %1826  ;;  %v639_v4 = vmul.f32 0.6931472, %v1825_v5  ;;  %v2652_v5 = vmax.f32 %v2051_v63, 0.0  ;;  %1840 = vpow2.f32 %v597_v41  ;;  %v565_v63 = vsub.f32 0.0, %v549_v9 }
 0x1e3   :  { %v1829_v8 = vpop.eup %1828  ;;  %v657_v57 = vmul.f32 0.6931472, %v1827_v56  ;;  %v2653_v23 = vmax.f32 %v2054_v3, 0.0  ;;  %v2654_v36 = vmax.f32 %v2062_v13, 0.0  ;;  %v2334_v55 = vadd.f32 %v2040_v54, %v455_v30 }
 0x1e4   :  { %v748_v58 = vadd.f32 %v636_v40, %v2652_v5  ;;  %v645_v6 = vsel %vm2271_vm8, %v642_v10, %v639_v4  ;;  %v666_v22 = vmul.f32 0.6931472, %v1829_v8  ;;  %v676_v40 = vmul.f32 -0.5, %v2250_v35 }
 0x1e5   :  { %v1831_v62 = vpop.eup %1830  ;;  %v593_v10 = vmul.f32 1.442695, %v565_v63  ;;  %v746_v8 = vadd.f32 %v618_v49, %v2653_v23  ;;  %v663_v4 = vsel %vm2281_vm9, %v660_v12, %v657_v57  ;;  %v749_v32 = vadd.f32 %v645_v6, %v2654_v36 }
 0x1e6   :  { %v2306_v43 = vpop.eup %1832  ;;  %v648_v61 = vmul.f32 0.6931472, %v1831_v62  ;;  %v764_v56 = vmul.f32 %v748_v58, %v2117_v0  ;;  %v672_v0 = vsel %vm2291_vm10, %v669_v51, %v666_v22  ;;  %v552_v62 = vand.u32 2147483647, %v2315_v15 }
 0x1e7   :  { %v700_v59 = vadd.f32 1.0, %v2306_v43  ;;  %v2319_v60 = vpop.eup %1834  ;;  %v696_v3 = vmul.f32 %v2241_v37, %v695_v14  ;;  %v679_v26 = vand.u32 2147483647, %v2250_v35  ;;  %v761_v13 = vmul.f32 %v745_v7, %v2096_v48 }
 0x1e8   :  { %v654_v39 = vsel %vm2295_vm11, %v651_v27, %v648_v61  ;;  %v682_v20 = vadd.f32 1.0, %v2319_v60  ;;  %v2655_v27 = vmax.f32 %v2072_v33, 0.0  ;;  %v780_v54 = vadd.f32 %v764_v56, %v2182_v25 }
 0x1e9   :  { %1842 = vlog2.f32 %v700_v59  ;;  %v2656_v19 = vmax.f32 %v2059_v11, 0.0  ;;  %v677_v51 = vadd.f32 1.0, %v676_v40  ;;  %v568_v50 = vsub.f32 0.0, %v552_v62  ;;  %v2470_v62 = vld [vmem:[%s2605_s1 + $0x130] sm:$0xff]  }
 0x1ea   :  { %v750_v53 = vadd.f32 %v654_v39, %v2655_v27  ;;  %1844 = vlog2.f32 %v682_v20  ;;  %v1837_v12 = vpop.eup %1836  ;;  %v2657_v2 = vmax.f32 %v2069_v29, 0.0  ;;  %v703_v58 = vmul.f32 -0.5, %v2306_v43 }
 0x1eb   :  { %1846 = vpow2.f32 %v593_v10  ;;  %v751_v46 = vadd.f32 %v663_v4, %v2656_v19  ;;  %v550_v61 = vand.u32 2147483647, %v2334_v55  ;;  %v762_v41 = vmul.f32 %v746_v8, %v2104_v52  ;;  %v2662_v4 = vld [vmem:[#allocation7_spill] sm:$0xff] }
 0x1ec   :  { %v1839_v33 = vpop.eup %1838  ;;  %v752_v5 = vadd.f32 %v672_v0, %v2657_v2  ;;  %v685_v48 = vmul.f32 -0.5, %v2319_v60  ;;  %v599_v7 = vmul.f32 1.442695, %v568_v50  ;;  %v765_v25 = vmul.f32 %v749_v32, %v2132_v21  ;;  %v2663_v0 = vld [vmem:[#allocation12_spill] sm:$0xff] }
 0x1ed   :  { %v766_v9 = vmul.f32 %v750_v53, %v2136_v16  ;;  %v693_v49 = vmul.f32 0.6931472, %v1837_v12  ;;  %v566_v57 = vsub.f32 0.0, %v550_v61  ;;  %v777_v59 = vadd.f32 %v761_v13, %v2173_v38 }
 0x1ee   :  { %v778_v29 = vadd.f32 %v762_v41, %v2193_v47  ;;  %v675_v6 = vmul.f32 0.6931472, %v1839_v33  ;;  %1848 = vpow2.f32 %v599_v7  ;;  %v781_v22 = vadd.f32 %v765_v25, %v2206_v1 }
 0x1ef   :  { %v782_v63 = vadd.f32 %v766_v9, %v2224_v24  ;;  %v678_v52 = vmul.f32 %v2250_v35, %v677_v51  ;;  %v704_v30 = vadd.f32 1.0, %v703_v58  ;;  %v595_v39 = vmul.f32 1.442695, %v566_v57  ;;  %v2362_v38 = vpop.eup %1840  ;;  %v2665_v51 = vld [vmem:[#allocation2_spill] sm:$0xff]  ;;  %v2670_v9 = vld [vmem:[#allocation8_spill] sm:$0xff] }
 0x1f0   :  { %v793_v14 = vpack.c.bf16 %v778_v29, %v777_v59  ;;  %v794_v21 = vpack.c.bf16 %v780_v54, %v779_v34  ;;  %v706_v16 = vand.u32 2147483647, %v2306_v43  ;;  %v768_v40 = vmul.f32 %v752_v5, %v2149_v28  ;;  %v2668_v5 = vld [vmem:[#allocation11_spill] sm:$0xff]  ;;  %v2671_v29 = vld [vmem:[#allocation9_spill] sm:$0xff] }
 0x1f1   :  { %v795_v56 = vpack.c.bf16 %v782_v63, %v781_v22  ;;  %v531_v47 = vmax.f32 %v2081_v42, 0.0  ;;  %vm2367_vm12 = vcmp.lt.f32.partialorder %v697_v18, 0.0004427343  ;;  %vm2371_vm13 = vcmp.lt.f32.partialorder %v679_v26, 0.0004427343 }
 0x1f2   :  { %1850 = vpow2.f32 %v595_v39  ;;  %1644 = vmatprep.mubr.bf16.mxu0 %v793_v14  ;;  %v699_v28 = vsel %vm2367_vm12, %v696_v3, %v693_v49  ;;  %v681_v34 = vsel %vm2371_vm13, %v678_v52, %v675_v6  ;;  %v686_v20 = vadd.f32 1.0, %v685_v48  ;;  %v2669_v48 = vld [vmem:[#allocation10_spill] sm:$0xff] }
 0x1f3   :  { %1645 = vmatmul.mubr.bf16.vlgmr.msra.gmra.mxu0 %v794_v21  ;;  %v767_v37 = vmul.f32 %v751_v46, %v2141_v17  ;;  %v529_v18 = vmax.f32 %v2085_v44, 0.0  ;;  %v705_v23 = vmul.f32 %v2306_v43, %v704_v30  ;;  %v688_v8 = vand.u32 2147483647, %v2319_v60 }
 0x1f4   :  { %1648 = vmatprep.mubr.bf16.mxu0 %v795_v56  ;;  %v532_v36 = vmax.f32 %v2662_v4, 0.0  ;;  %vm707_vm14 = vcmp.lt.f32.partialorder %v706_v16, 0.0004427343  ;;  %v727_v32 = vadd.f32 1.0, %v2362_v38  ;;  %v784_v27 = vadd.f32 %v768_v40, %v2663_v0 }
 0x1f5   :  { %v476_v17 = vsel %vm469_vm3, %v2059_v11, 0.0  ;;  %v755_v3 = vadd.f32 %v699_v28, %v531_v47  ;;  %v753_v26 = vadd.f32 %v681_v34, %v529_v18  ;;  %v687_v19 = vmul.f32 %v2319_v60, %v686_v20 }
 0x1f6   :  { %v1843_v24 = vpop.eup %1842  ;;  %v783_v46 = vadd.f32 %v767_v37, %v476_v17  ;;  %v2666_v50 = vunpack.c.l.bf16 %v2665_v51  ;;  %v530_v58 = vmax.f32 %v2668_v5, 0.0  ;;  %vm689_vm15 = vcmp.lt.f32.partialorder %v688_v8, 0.0004427343 }
 0x1f7   :  { %v702_v10 = vmul.f32 0.6931472, %v1843_v24  ;;  %v1845_v53 = vpop.eup %1844  ;;  %1852 = vlog2.f32 %v727_v32  ;;  %v769_v49 = vmul.f32 %v753_v26, %v2670_v9  ;;  %v481_v59 = vsel %vm469_vm3, %v2662_v4, 0.0 }
 0x1f8   :  { %v1847_v12 = vpop.eup %1846  ;;  %v684_v54 = vmul.f32 0.6931472, %v1845_v53  ;;  %v515_v2 = vsel %vm2089_vm2, %v2666_v50, 0.0  ;;  %v796_v11 = vpack.c.bf16 %v784_v27, %v783_v46  ;;  %v478_v22 = vsel %vm469_vm3, %v2085_v44, 0.0  ;;  %v2673_v53 = vld [vmem:[#allocation4_spill] sm:$0xff] }
 0x1f9   :  { %v708_v13 = vsel %vm707_vm14, %v705_v23, %v702_v10  ;;  %v709_v61 = vadd.f32 1.0, %v1847_v12  ;;  %v771_v60 = vmul.f32 %v755_v3, %v515_v2  ;;  %v479_v63 = vsel %vm469_vm3, %v2668_v5, 0.0  ;;  %v1860_v5 = vld [vmem:[%s2606_s0 + $0x30] sm:$0xff]  }
 0x1fa   :  { %v756_v43 = vadd.f32 %v708_v13, %v532_v36  ;;  %v690_v41 = vsel %vm689_vm15, %v687_v19, %v684_v54  ;;  %v480_v39 = vsel %vm469_vm3, %v2081_v42, 0.0  ;;  %v785_v14 = vadd.f32 %v769_v49, %v478_v22  ;;  %v2672_v36 = vld [vmem:[#allocation3_spill] sm:$0xff] }
 0x1fb   :  { %v754_v25 = vadd.f32 %v690_v41, %v530_v58  ;;  %1854 = vlog2.f32 %v709_v61  ;;  %1649 = vmatmul.mubr.bf16.gmra.mxu0 %v796_v11  ;;  %v1849_v57 = vpop.eup %1848  ;;  %v787_v56 = vadd.f32 %v771_v60, %v480_v39  ;;  %v712_v35 = vmul.f32 -0.5, %v1847_v12 }
 0x1fc   :  { %v772_v7 = vmul.f32 %v756_v43, %v2669_v48  ;;  %v736_v52 = vadd.f32 1.0, %v1849_v57  ;;  %v730_v44 = vmul.f32 -0.5, %v2362_v38  ;;  %v739_v24 = vmul.f32 -0.5, %v1849_v57 }
 0x1fd   :  { %v770_v6 = vmul.f32 %v754_v25, %v2671_v29  ;;  %v713_v34 = vadd.f32 1.0, %v712_v35  ;;  %v715_v42 = vand.u32 2147483647, %v1847_v12  ;;  %v733_v18 = vand.u32 2147483647, %v2362_v38 }
 0x1fe   :  { %v788_v30 = vadd.f32 %v772_v7, %v481_v59  ;;  %1856 = vlog2.f32 %v736_v52  ;;  %v731_v37 = vadd.f32 1.0, %v730_v44  ;;  %v740_v4 = vadd.f32 1.0, %v739_v24 }
 0x1ff   :  { %v786_v21 = vadd.f32 %v770_v6, %v479_v63  ;;  %v1851_v16 = vpop.eup %1850  ;;  %v501_v32 = vunpack.c.l.bf16 %v2672_v36  ;;  %v714_v0 = vmul.f32 %v1847_v12, %v713_v34  ;;  %v742_v27 = vand.u32 2147483647, %v1849_v57  ;;  %v2476_v34 = vld [vmem:[%s2605_s1 + $0x128] sm:$0xff]  }
 0x200   :  { %v718_v40 = vadd.f32 1.0, %v1851_v16  ;;  %v798_v1 = vpack.c.bf16 %v788_v30, %v787_v56  ;;  %v721_v23 = vmul.f32 -0.5, %v1851_v16  ;;  %v503_v17 = vunpack.c.l.bf16 %v2673_v53 }
 0x201   :  { %v797_v47 = vpack.c.bf16 %v786_v21, %v785_v14  ;;  %v504_v3 = vunpack.c.h.bf16 %v2673_v53  ;;  %v732_v26 = vmul.f32 %v2362_v38, %v731_v37  ;;  %vm2416_vm0 = vcmp.lt.f32.partialorder %v715_v42, 0.0004427343  ;;  %v2490_v37 = vld [vmem:[%s2605_s1 + $0x118] sm:$0xff]  }
 0x202   :  { %1858 = vlog2.f32 %v718_v40  ;;  %vm2420_vm1 = vcmp.lt.f32.partialorder %v733_v18, 0.0004427343  ;;  %v533_v19 = vmax.f32 %v2287_v31, 0.0  ;;  %v722_v46 = vadd.f32 1.0, %v721_v23  ;;  %v2498_v18 = vld [vmem:[%s2607_s2 + $0x2] ss:$0 sm:$0xff] }
 0x203   :  { %1652 = vmatprep.mubr.bf16.mxu0 %v797_v47  ;;  %v741_v38 = vmul.f32 %v1849_v57, %v740_v4  ;;  %v724_v2 = vand.u32 2147483647, %v1851_v16  ;;  %v502_v58 = vunpack.c.h.bf16 %v1860_v5  ;;  %v535_v61 = vmax.f32 %v2265_v45, 0.0 }
 0x204   :  { %1653 = vmatmul.mubr.bf16.gmra.mxu0 %v798_v1  ;;  %v1853_v28 = vpop.eup %1852  ;;  %v536_v41 = vmax.f32 %v2315_v15, 0.0  ;;  %vm743_vm4 = vcmp.lt.f32.partialorder %v742_v27, 0.0004427343  ;;  %v517_v48 = vsel %vm2089_vm2, %v501_v32, 0.0  ;;  %v520_v7 = vsel %vm2089_vm2, %v504_v3, 0.0 }
 0x205   :  { %v729_v8 = vmul.f32 0.6931472, %v1853_v28  ;;  %v723_v59 = vmul.f32 %v1851_v16, %v722_v46  ;;  %v519_v29 = vsel %vm2089_vm2, %v503_v17, 0.0  ;;  %v534_v6 = vmax.f32 %v2334_v55, 0.0 }
 0x206   :  { %vm725_vm5 = vcmp.lt.f32.partialorder %v724_v2, 0.0004427343  ;;  %v518_v22 = vsel %vm2089_vm2, %v502_v58, 0.0  ;;  %v485_v21 = vsel %vm469_vm3, %v2315_v15, 0.0  ;;  %v482_v16 = vsel %vm469_vm3, %v2287_v31, 0.0  ;;  %v1777_v31 = vld [vmem:[%s2605_s1 + $0xd0] sm:$0xff]  }
 0x207   :  { %v735_v51 = vsel %vm2420_vm1, %v732_v26, %v729_v8  ;;  %v483_v40 = vsel %vm469_vm3, %v2334_v55, 0.0  ;;  %v484_v47 = vsel %vm469_vm3, %v2265_v45, 0.0  ;;  %1670 = vmatprep.subr.bf16.mxu1 %v1777_v31  ;;  %v1778_v15 = vld [vmem:[%s2605_s1 + $0xc8] sm:$0xff]   ;;  %v1779_v45 = vld [vmem:[%s2605_s1 + $0xc0] sm:$0xff]   ;;  %v1780_v55 = vld [vmem:[%s2605_s1 + $0x138] sm:$0xff]  }
 0x208   :  { %v1855_v20 = vpop.eup %1854  ;;  %v759_v49 = vadd.f32 %v735_v51, %v535_v61  ;;  %1671 = vmatpush3.bf16.msra.mxu1 %v1777_v31  ;;  %1692 = vmatprep.subr.bf16.mxu0 %v1780_v55 }
 0x209   :  { %v711_v10 = vmul.f32 0.6931472, %v1855_v20  ;;  %1672 = vmatprep.subr.bf16.mxu1 %v1778_v15  ;;  %1693 = vmatpush3.bf16.msra.mxu0 %v1780_v55  ;;  %v2483_v20 = vld [vmem:[%s2605_s1 + $0x120] sm:$0xff]  }
 0x20a   :  { %v775_v14 = vmul.f32 %v759_v49, %v519_v29  ;;  %1694 = vmatprep.subr.bf16.mxu0 %v2470_v62 }
 0x20b   :  { %v1857_v43 = vpop.eup %1856  ;;  %v717_v12 = vsel %vm2416_vm0, %v714_v0, %v711_v10 }
 0x20c   :  { %v738_v50 = vmul.f32 0.6931472, %v1857_v43  ;;  %v757_v25 = vadd.f32 %v717_v12, %v533_v19  ;;  %v791_v44 = vadd.f32 %v775_v14, %v484_v47  ;;  %1673 = vmatpush3.bf16.msra.mxu1 %v1778_v15 }
 0x20d   :  { %1674 = vmatprep.subr.bf16.mxu1 %v1779_v45  ;;  %1695 = vmatpush3.bf16.msra.mxu0 %v2470_v62 }
 0x20e   :  { %v744_v9 = vsel %vm743_vm4, %v741_v38, %v738_v50  ;;  %v773_v39 = vmul.f32 %v757_v25, %v517_v48  ;;  %1696 = vmatprep.subr.bf16.mxu0 %v2476_v34 }
 0x20f   :  { %v1859_v11 = vpop.eup %1858  ;;  %v760_v60 = vadd.f32 %v744_v9, %v536_v41 }
 0x210   :  { %v720_v57 = vmul.f32 0.6931472, %v1859_v11  ;;  %v789_v1 = vadd.f32 %v773_v39, %v482_v16  ;;  %1675 = vmatpush3.bf16.msra.mxu1 %v1779_v45 }
 0x211   :  { %v776_v52 = vmul.f32 %v760_v60, %v520_v7  ;;  %1724 = vmatprep.subr.bf16.mxu1 %v1780_v55  ;;  %1697 = vmatpush3.bf16.msra.mxu0 %v2476_v34 }
 0x212   :  { %v726_v63 = vsel %vm725_vm5, %v723_v59, %v720_v57  ;;  %1698 = vmatprep.subr.bf16.mxu0 %v2483_v20 }
 0x213   :  { %v758_v30 = vadd.f32 %v726_v63, %v534_v6  ;;  %v792_v33 = vadd.f32 %v776_v52, %v485_v21 }
 0x215   :  { %v774_v56 = vmul.f32 %v758_v30, %v518_v22  ;;  %v800_v28 = vpack.c.bf16 %v792_v33, %v791_v44  ;;  %1699 = vmatpush3.bf16.msra.mxu0 %v2483_v20 }
 0x216   :  { %1700 = vmatprep.subr.bf16.mxu0 %v2490_v37 }
 0x217   :  { %v790_v35 = vadd.f32 %v774_v56, %v483_v40 }
 0x219   :  { %v799_v24 = vpack.c.bf16 %v790_v35, %v789_v1  ;;  %1701 = vmatpush3.bf16.msra.mxu0 %v2490_v37 }
 0x21b   :  { %1656 = vmatprep.mubr.bf16.mxu0 %v799_v24 }
 0x21c   :  { %1657 = vmatmul.mubr.bf16.gmra.mxu0 %v800_v28 }
 0x2b3   :  { %v1646_v42 = vpop.f32.mrf.mxu0 }
 0x2b4   :  { %v913_v8 = vadd.f32 %v1646_v42, %v2498_v18 }
 0x2b5   :  { %v904_v10 = vpop.f32.mrf.mxu0 }
 0x2b6   :  { %v905_v23 = vadd.f32 %v2498_v18, %v904_v10  ;;  %v985_v17 = vmul.f32 0.01, %v913_v8  ;;  %vm969_vm6 = vcmp.gt.f32.partialorder %v913_v8, 0.0 }
 0x2b7   :  { %v1647_v4 = vpop.f32.mrf.mxu0 }
 0x2b8   :  { %v916_v36 = vadd.f32 %v1647_v4, %v2498_v18  ;;  %v983_v0 = vmul.f32 0.01, %v905_v23  ;;  %vm967_vm3 = vcmp.gt.f32.partialorder %v905_v23, 0.0  ;;  %v1001_v46 = vsel %vm969_vm6, %v913_v8, %v985_v17  ;;  %v1787_v17 = vld [vmem:[%s2605_s1 + $0x100] sm:$0xff]  }
 0x2b9   :  { %v907_v32 = vpop.f32.mrf.mxu0 }
 0x2ba   :  { %vm970_vm2 = vcmp.gt.f32.partialorder %v916_v36, 0.0  ;;  %v986_v27 = vmul.f32 0.01, %v916_v36  ;;  %v908_v53 = vadd.f32 %v2498_v18, %v907_v32  ;;  %v999_v19 = vsel %vm967_vm3, %v905_v23, %v983_v0 }
 0x2bb   :  { %v1650_v3 = vpop.f32.mrf.mxu0 }
 0x2bc   :  { %vm968_vm7 = vcmp.gt.f32.partialorder %v908_v53, 0.0  ;;  %v984_v26 = vmul.f32 0.01, %v908_v53  ;;  %v1002_v13 = vsel %vm970_vm2, %v916_v36, %v986_v27  ;;  %v929_v51 = vadd.f32 %v1650_v3, %v2498_v18 }
 0x2bd   :  { %v920_v43 = vpop.f32.mrf.mxu0  ;;  %v1016_v2 = vpack.c.bf16 %v1002_v13, %v1001_v46 }
 0x2be   :  { %v921_v54 = vadd.f32 %v2498_v18, %v920_v43  ;;  %v1000_v12 = vsel %vm968_vm7, %v908_v53, %v984_v26  ;;  %v989_v48 = vmul.f32 0.01, %v929_v51  ;;  %vm973_vm10 = vcmp.gt.f32.partialorder %v929_v51, 0.0  ;;  %v1785_v53 = vld [vmem:[%s2605_s1 + $0x110] sm:$0xff]   ;;  %v2536_v26 = vld [vmem:[%s2607_s2 + $0x3] ss:$0 sm:$0xff] }
 0x2bf   :  { %v1651_v50 = vpop.f32.mrf.mxu0  ;;  %v1015_v38 = vpack.c.bf16 %v1000_v12, %v999_v19  ;;  %1702 = vmatprep.subr.bf16.mxu0 %v1785_v53 }
 0x2c0   :  { %v932_v5 = vadd.f32 %v1651_v50, %v2498_v18  ;;  %v987_v61 = vmul.f32 0.01, %v921_v54  ;;  %vm971_vm9 = vcmp.gt.f32.partialorder %v921_v54, 0.0  ;;  %v1005_v63 = vsel %vm973_vm10, %v929_v51, %v989_v48  ;;  %1703 = vmatpush3.bf16.msra.mxu0 %v1785_v53 }
 0x2c1   :  { %v923_v58 = vpop.f32.mrf.mxu0  ;;  %1676 = vmatprep.mubr.bf16.mxu1 %v1015_v38 }
 0x2c2   :  { %vm974_vm8 = vcmp.gt.f32.partialorder %v932_v5, 0.0  ;;  %v990_v41 = vmul.f32 0.01, %v932_v5  ;;  %v924_v11 = vadd.f32 %v2498_v18, %v923_v58  ;;  %1677 = vmatmul.mubr.bf16.vlgmr.msra.gmra.mxu1 %v1016_v2  ;;  %v1003_v57 = vsel %vm971_vm9, %v921_v54, %v987_v61 }
 0x2c3   :  { %1732 = vmatpush3.bf16.msra.mxu1 %v1780_v55 }
 0x2c4   :  { %v1654_v7 = vpop.f32.mrf.mxu0  ;;  %vm972_vm11 = vcmp.gt.f32.partialorder %v924_v11, 0.0  ;;  %v988_v25 = vmul.f32 0.01, %v924_v11  ;;  %1725 = vmatprep.subr.bf16.mxu1 %v2470_v62  ;;  %v1006_v49 = vsel %vm974_vm8, %v932_v5, %v990_v41 }
 0x2c5   :  { %v945_v29 = vadd.f32 %v1654_v7, %v2498_v18  ;;  %v1018_v30 = vpack.c.bf16 %v1006_v49, %v1005_v63 }
 0x2c6   :  { %v936_v9 = vpop.f32.mrf.mxu0  ;;  %v1004_v59 = vsel %vm972_vm11, %v924_v11, %v988_v25 }
 0x2c7   :  { %v937_v60 = vadd.f32 %v2498_v18, %v936_v9  ;;  %v1017_v22 = vpack.c.bf16 %v1004_v59, %v1003_v57  ;;  %1733 = vmatpush3.bf16.msra.mxu1 %v2470_v62  ;;  %v993_v16 = vmul.f32 0.01, %v945_v29  ;;  %vm977_vm14 = vcmp.gt.f32.partialorder %v945_v29, 0.0 }
 0x2c8   :  { %v1655_v6 = vpop.f32.mrf.mxu0  ;;  %1726 = vmatprep.subr.bf16.mxu1 %v2476_v34 }
 0x2c9   :  { %v948_v52 = vadd.f32 %v1655_v6, %v2498_v18  ;;  %1680 = vmatprep.mubr.bf16.mxu1 %v1017_v22  ;;  %v991_v14 = vmul.f32 0.01, %v937_v60  ;;  %vm975_vm13 = vcmp.gt.f32.partialorder %v937_v60, 0.0  ;;  %v1009_v44 = vsel %vm977_vm14, %v945_v29, %v993_v16 }
 0x2ca   :  { %v939_v39 = vpop.f32.mrf.mxu0  ;;  %1681 = vmatmul.mubr.bf16.gmra.mxu1 %v1018_v30 }
 0x2cb   :  { %vm978_vm12 = vcmp.gt.f32.partialorder %v948_v52, 0.0  ;;  %v994_v21 = vmul.f32 0.01, %v948_v52  ;;  %v940_v56 = vadd.f32 %v2498_v18, %v939_v39  ;;  %1734 = vmatpush3.bf16.msra.mxu1 %v2476_v34  ;;  %v1007_v47 = vsel %vm975_vm13, %v937_v60, %v991_v14 }
 0x2cc   :  { %1727 = vmatprep.subr.bf16.mxu1 %v2483_v20 }
 0x2cd   :  { %vm976_vm15 = vcmp.gt.f32.partialorder %v940_v56, 0.0  ;;  %v992_v40 = vmul.f32 0.01, %v940_v56  ;;  %v1010_v33 = vsel %vm978_vm12, %v948_v52, %v994_v21 }
 0x2ce   :  { %v1020_v24 = vpack.c.bf16 %v1010_v33, %v1009_v44 }
 0x2cf   :  { %v1008_v1 = vsel %vm976_vm15, %v940_v56, %v992_v40  ;;  %1735 = vmatpush3.bf16.msra.mxu1 %v2483_v20 }
 0x2d0   :  { %v1019_v35 = vpack.c.bf16 %v1008_v1, %v1007_v47  ;;  %1728 = vmatprep.subr.bf16.mxu1 %v2490_v37 }
 0x2d2   :  { %1684 = vmatprep.mubr.bf16.mxu1 %v1019_v35 }
 0x2d3   :  { %1685 = vmatmul.mubr.bf16.gmra.mxu1 %v1020_v24 }
 0x2d4   :  { %1736 = vmatpush3.bf16.msra.mxu1 %v2490_v37 }
 0x2d5   :  { %1729 = vmatprep.subr.bf16.mxu1 %v1785_v53 }
 0x2d8   :  { %1737 = vmatpush3.bf16.msra.mxu1 %v1785_v53 }
 0x2dc   :  { %v1658_v28 = vpop.f32.mrf.mxu0 }
 0x2dd   :  { %v961_v45 = vadd.f32 %v1658_v28, %v2498_v18 }
 0x2de   :  { %v952_v31 = vpop.f32.mrf.mxu0 }
 0x2df   :  { %v953_v15 = vadd.f32 %v2498_v18, %v952_v31  ;;  %v997_v23 = vmul.f32 0.01, %v961_v45  ;;  %vm981_vm4 = vcmp.gt.f32.partialorder %v961_v45, 0.0 }
 0x2e0   :  { %v1659_v55 = vpop.f32.mrf.mxu0 }
 0x2e1   :  { %v964_v62 = vadd.f32 %v1659_v55, %v2498_v18  ;;  %v995_v42 = vmul.f32 0.01, %v953_v15  ;;  %vm979_vm1 = vcmp.gt.f32.partialorder %v953_v15, 0.0  ;;  %v1013_v0 = vsel %vm981_vm4, %v961_v45, %v997_v23 }
 0x2e2   :  { %v955_v34 = vpop.f32.mrf.mxu0 }
 0x2e3   :  { %vm982_vm0 = vcmp.gt.f32.partialorder %v964_v62, 0.0  ;;  %v998_v20 = vmul.f32 0.01, %v964_v62  ;;  %v956_v10 = vadd.f32 %v2498_v18, %v955_v34  ;;  %v1011_v4 = vsel %vm979_vm1, %v953_v15, %v995_v42  ;;  %v1786_v18 = vld [vmem:[%s2605_s1 + $0x108] sm:$0xff]  }
 0x2e4   :  { %1704 = vmatprep.subr.bf16.mxu0 %v1786_v18  ;;  %1730 = vmatprep.subr.bf16.mxu1 %v1786_v18 }
 0x2e5   :  { %vm980_vm5 = vcmp.gt.f32.partialorder %v956_v10, 0.0  ;;  %v996_v37 = vmul.f32 0.01, %v956_v10  ;;  %v1014_v8 = vsel %vm982_vm0, %v964_v62, %v998_v20  ;;  %1705 = vmatpush3.bf16.msra.mxu0 %v1786_v18  ;;  %1738 = vmatpush3.bf16.msra.mxu1 %v1786_v18 }
 0x2e6   :  { %v1022_v27 = vpack.c.bf16 %v1014_v8, %v1013_v0  ;;  %1706 = vmatprep.subr.bf16.mxu0 %v1787_v17  ;;  %1731 = vmatprep.subr.bf16.mxu1 %v1787_v17 }
 0x2e7   :  { %v1012_v36 = vsel %vm980_vm5, %v956_v10, %v996_v37 }
 0x2e8   :  { %v1021_v32 = vpack.c.bf16 %v1012_v36, %v1011_v4 }
 0x2e9   :  { %1707 = vmatpush3.bf16.msra.mxu0 %v1787_v17  ;;  %1739 = vmatpush3.bf16.msra.mxu1 %v1787_v17 }
 0x2ea   :  { %1688 = vmatprep.mubr.bf16.mxu1 %v1021_v32 }
 0x2eb   :  { %1689 = vmatmul.mubr.bf16.gmra.mxu1 %v1022_v27 }
 0x382   :  { %v1678_v3 = vpop.f32.mrf.mxu1 }
 0x383   :  { %v1135_v54 = vadd.f32 %v1678_v3, %v2536_v26 }
 0x384   :  { %v1126_v13 = vpop.f32.mrf.mxu1 }
 0x385   :  { %v1127_v43 = vadd.f32 %v2536_v26, %v1126_v13  ;;  %v1207_v2 = vmul.f32 0.01, %v1135_v54  ;;  %vm1191_vm6 = vcmp.gt.f32.partialorder %v1135_v54, 0.0 }
 0x386   :  { %v1679_v19 = vpop.f32.mrf.mxu1 }
 0x387   :  { %v1138_v12 = vadd.f32 %v1679_v19, %v2536_v26  ;;  %v1205_v51 = vmul.f32 0.01, %v1127_v43  ;;  %vm1189_vm3 = vcmp.gt.f32.partialorder %v1127_v43, 0.0  ;;  %v1223_v25 = vsel %vm1191_vm6, %v1135_v54, %v1207_v2 }
 0x388   :  { %v1129_v46 = vpop.f32.mrf.mxu1 }
 0x389   :  { %vm1192_vm2 = vcmp.gt.f32.partialorder %v1138_v12, 0.0  ;;  %v1208_v50 = vmul.f32 0.01, %v1138_v12  ;;  %v1130_v38 = vadd.f32 %v2536_v26, %v1129_v46  ;;  %v1221_v48 = vsel %vm1189_vm3, %v1127_v43, %v1205_v51 }
 0x38a   :  { %v1682_v5 = vpop.f32.mrf.mxu1 }
 0x38b   :  { %vm1190_vm7 = vcmp.gt.f32.partialorder %v1130_v38, 0.0  ;;  %v1206_v58 = vmul.f32 0.01, %v1130_v38  ;;  %v1224_v61 = vsel %vm1192_vm2, %v1138_v12, %v1208_v50  ;;  %v1151_v9 = vadd.f32 %v1682_v5, %v2536_v26 }
 0x38c   :  { %v1142_v41 = vpop.f32.mrf.mxu1  ;;  %v1238_v57 = vpack.c.bf16 %v1224_v61, %v1223_v25 }
 0x38d   :  { %v1143_v11 = vadd.f32 %v2536_v26, %v1142_v41  ;;  %v1222_v7 = vsel %vm1190_vm7, %v1130_v38, %v1206_v58  ;;  %v1211_v52 = vmul.f32 0.01, %v1151_v9  ;;  %vm1195_vm10 = vcmp.gt.f32.partialorder %v1151_v9, 0.0  ;;  %v1475_v38 = vld [vmem:[%s2607_s2 + $0x4] ss:$0 sm:$0xff] }
 0x38e   :  { %v1683_v49 = vpop.f32.mrf.mxu1  ;;  %v1237_v60 = vpack.c.bf16 %v1222_v7, %v1221_v48 }
 0x38f   :  { %v1154_v59 = vadd.f32 %v1683_v49, %v2536_v26  ;;  %v1209_v6 = vmul.f32 0.01, %v1143_v11  ;;  %vm1193_vm9 = vcmp.gt.f32.partialorder %v1143_v11, 0.0  ;;  %v1227_v35 = vsel %vm1195_vm10, %v1151_v9, %v1211_v52 }
 0x390   :  { %v1145_v29 = vpop.f32.mrf.mxu1  ;;  %1708 = vmatprep.mubr.bf16.mxu0 %v1237_v60 }
 0x391   :  { %vm1196_vm8 = vcmp.gt.f32.partialorder %v1154_v59, 0.0  ;;  %v1212_v22 = vmul.f32 0.01, %v1154_v59  ;;  %v1146_v63 = vadd.f32 %v2536_v26, %v1145_v29  ;;  %1709 = vmatmul.mubr.bf16.vlgmr.msra.gmra.mxu0 %v1238_v57  ;;  %v1225_v16 = vsel %vm1193_vm9, %v1143_v11, %v1209_v6 }
 0x393   :  { %v1686_v30 = vpop.f32.mrf.mxu1  ;;  %vm1194_vm11 = vcmp.gt.f32.partialorder %v1146_v63, 0.0  ;;  %v1210_v39 = vmul.f32 0.01, %v1146_v63  ;;  %v1228_v21 = vsel %vm1196_vm8, %v1154_v59, %v1212_v22 }
 0x394   :  { %v1167_v33 = vadd.f32 %v1686_v30, %v2536_v26  ;;  %v1240_v24 = vpack.c.bf16 %v1228_v21, %v1227_v35 }
 0x395   :  { %v1158_v14 = vpop.f32.mrf.mxu1  ;;  %v1226_v40 = vsel %vm1194_vm11, %v1146_v63, %v1210_v39 }
 0x396   :  { %v1159_v56 = vadd.f32 %v2536_v26, %v1158_v14  ;;  %v1239_v1 = vpack.c.bf16 %v1226_v40, %v1225_v16  ;;  %v1215_v55 = vmul.f32 0.01, %v1167_v33  ;;  %vm1199_vm14 = vcmp.gt.f32.partialorder %v1167_v33, 0.0 }
 0x397   :  { %v1687_v47 = vpop.f32.mrf.mxu1 }
 0x398   :  { %v1170_v44 = vadd.f32 %v1687_v47, %v2536_v26  ;;  %1712 = vmatprep.mubr.bf16.mxu0 %v1239_v1  ;;  %v1213_v31 = vmul.f32 0.01, %v1159_v56  ;;  %vm1197_vm13 = vcmp.gt.f32.partialorder %v1159_v56, 0.0  ;;  %v1231_v10 = vsel %vm1199_vm14, %v1167_v33, %v1215_v55 }
 0x399   :  { %v1161_v28 = vpop.f32.mrf.mxu1  ;;  %1713 = vmatmul.mubr.bf16.gmra.mxu0 %v1240_v24 }
 0x39a   :  { %vm1200_vm12 = vcmp.gt.f32.partialorder %v1170_v44, 0.0  ;;  %v1216_v15 = vmul.f32 0.01, %v1170_v44  ;;  %v1162_v45 = vadd.f32 %v2536_v26, %v1161_v28  ;;  %v1229_v42 = vsel %vm1197_vm13, %v1159_v56, %v1213_v31 }
 0x39c   :  { %vm1198_vm15 = vcmp.gt.f32.partialorder %v1162_v45, 0.0  ;;  %v1214_v62 = vmul.f32 0.01, %v1162_v45  ;;  %v1232_v34 = vsel %vm1200_vm12, %v1170_v44, %v1216_v15 }
 0x39d   :  { %v1242_v37 = vpack.c.bf16 %v1232_v34, %v1231_v10 }
 0x39e   :  { %v1230_v20 = vsel %vm1198_vm15, %v1162_v45, %v1214_v62 }
 0x39f   :  { %v1241_v23 = vpack.c.bf16 %v1230_v20, %v1229_v42 }
 0x3a1   :  { %1716 = vmatprep.mubr.bf16.mxu1 %v1241_v23 }
 0x3a2   :  { %1717 = vmatmul.mubr.bf16.vlgmr.msra.gmra.mxu1 %v1242_v37 }
 0x3ab   :  { %v1690_v8 = vpop.f32.mrf.mxu1 }
 0x3ac   :  { %v1183_v32 = vadd.f32 %v1690_v8, %v2536_v26 }
 0x3ad   :  { %v1174_v4 = vpop.f32.mrf.mxu1 }
 0x3ae   :  { %v1175_v36 = vadd.f32 %v2536_v26, %v1174_v4  ;;  %v1219_v13 = vmul.f32 0.01, %v1183_v32  ;;  %vm1203_vm4 = vcmp.gt.f32.partialorder %v1183_v32, 0.0 }
 0x3af   :  { %v1691_v0 = vpop.f32.mrf.mxu1 }
 0x3b0   :  { %v1186_v27 = vadd.f32 %v1691_v0, %v2536_v26  ;;  %v1217_v18 = vmul.f32 0.01, %v1175_v36  ;;  %vm1201_vm1 = vcmp.gt.f32.partialorder %v1175_v36, 0.0  ;;  %v1235_v51 = vsel %vm1203_vm4, %v1183_v32, %v1219_v13 }
 0x3b1   :  { %v1177_v53 = vpop.f32.mrf.mxu1 }
 0x3b2   :  { %vm1204_vm0 = vcmp.gt.f32.partialorder %v1186_v27, 0.0  ;;  %v1220_v17 = vmul.f32 0.01, %v1186_v27  ;;  %v1178_v3 = vadd.f32 %v2536_v26, %v1177_v53  ;;  %v1233_v19 = vsel %vm1201_vm1, %v1175_v36, %v1217_v18 }
 0x3b4   :  { %vm1202_vm5 = vcmp.gt.f32.partialorder %v1178_v3, 0.0  ;;  %v1218_v43 = vmul.f32 0.01, %v1178_v3  ;;  %v1236_v54 = vsel %vm1204_vm0, %v1186_v27, %v1220_v17 }
 0x3b5   :  { %v1244_v50 = vpack.c.bf16 %v1236_v54, %v1235_v51 }
 0x3b6   :  { %v1234_v12 = vsel %vm1202_vm5, %v1178_v3, %v1218_v43 }
 0x3b7   :  { %v1243_v46 = vpack.c.bf16 %v1234_v12, %v1233_v19 }
 0x3b9   :  { %1720 = vmatprep.mubr.bf16.mxu1 %v1243_v46 }
 0x3ba   :  { %1721 = vmatmul.mubr.bf16.gmra.mxu1 %v1244_v50 }
 0x451   :  { %v1710_v2 = vpop.f32.mrf.mxu0 }
 0x452   :  { %v1357_v5 = vadd.f32 %v1710_v2, %v1475_v38 }
 0x453   :  { %v1348_v26 = vpop.f32.mrf.mxu0 }
 0x454   :  { %1413 = vst [vmem:[%s2608_s3 + $0x10] sm:$0xff] %v1357_v5  ;;  %v1349_v58 = vadd.f32 %v1475_v38, %v1348_v26 }
 0x455   :  { %v1711_v61 = vpop.f32.mrf.mxu0 }
 0x456   :  { %1411 = vst [vmem:[%s2608_s3] sm:$0xff] %v1349_v58  ;;  %v1360_v41 = vadd.f32 %v1711_v61, %v1475_v38 }
 0x457   :  { %v1351_v11 = vpop.f32.mrf.mxu0 }
 0x458   :  { %1414 = vst [vmem:[%s2608_s3 + $0x18] sm:$0xff] %v1360_v41  ;;  %v1352_v48 = vadd.f32 %v1475_v38, %v1351_v11 }
 0x459   :  { %v1714_v7 = vpop.f32.mrf.mxu0 }
 0x45a   :  { %1412 = vst [vmem:[%s2608_s3 + $0x8] sm:$0xff] %v1352_v48  ;;  %v1373_v25 = vadd.f32 %v1714_v7, %v1475_v38 }
 0x45b   :  { %v1364_v9 = vpop.f32.mrf.mxu0 }
 0x45c   :  { %1417 = vst [vmem:[%s2608_s3 + $0x30] sm:$0xff] %v1373_v25  ;;  %v1365_v49 = vadd.f32 %v1475_v38, %v1364_v9 }
 0x45d   :  { %v1715_v60 = vpop.f32.mrf.mxu0 }
 0x45e   :  { %1415 = vst [vmem:[%s2608_s3 + $0x20] sm:$0xff] %v1365_v49  ;;  %v1376_v57 = vadd.f32 %v1715_v60, %v1475_v38 }
 0x45f   :  { %v1367_v59 = vpop.f32.mrf.mxu0 }
 0x460   :  { %1418 = vst [vmem:[%s2608_s3 + $0x38] sm:$0xff] %v1376_v57  ;;  %v1368_v29 = vadd.f32 %v1475_v38, %v1367_v59 }
 0x462   :  { %v1718_v6 = vpop.f32.mrf.mxu1  ;;  %1416 = vst [vmem:[%s2608_s3 + $0x28] sm:$0xff] %v1368_v29 }
 0x463   :  { %v1389_v22 = vadd.f32 %v1718_v6, %v1475_v38 }
 0x464   :  { %v1380_v63 = vpop.f32.mrf.mxu1 }
 0x465   :  { %1421 = vst [vmem:[%s2608_s3 + $0x50] sm:$0xff] %v1389_v22  ;;  %v1381_v52 = vadd.f32 %v1475_v38, %v1380_v63 }
 0x466   :  { %v1719_v30 = vpop.f32.mrf.mxu1 }
 0x467   :  { %1419 = vst [vmem:[%s2608_s3 + $0x40] sm:$0xff] %v1381_v52  ;;  %v1392_v39 = vadd.f32 %v1719_v30, %v1475_v38 }
 0x468   :  { %v1383_v14 = vpop.f32.mrf.mxu1 }
 0x469   :  { %1422 = vst [vmem:[%s2608_s3 + $0x58] sm:$0xff] %v1392_v39  ;;  %v1384_v21 = vadd.f32 %v1475_v38, %v1383_v14 }
 0x46b   :  { %1420 = vst [vmem:[%s2608_s3 + $0x48] sm:$0xff] %v1384_v21 }
 0x47a   :  { %v1722_v56 = vpop.f32.mrf.mxu1 }
 0x47b   :  { %v1405_v16 = vadd.f32 %v1722_v56, %v1475_v38 }
 0x47c   :  { %v1396_v40 = vpop.f32.mrf.mxu1 }
 0x47d   :  { %1425 = vst [vmem:[%s2608_s3 + $0x70] sm:$0xff] %v1405_v16  ;;  %v1397_v33 = vadd.f32 %v1475_v38, %v1396_v40 }
 0x47e   :  { %v1723_v47 = vpop.f32.mrf.mxu1 }
 0x47f   :  { %1423 = vst [vmem:[%s2608_s3 + $0x60] sm:$0xff] %v1397_v33  ;;  %v1408_v1 = vadd.f32 %v1723_v47, %v1475_v38 }
 0x480   :  { %v1399_v35 = vpop.f32.mrf.mxu1 }
 0x481   :  { %1426 = vst [vmem:[%s2608_s3 + $0x78] sm:$0xff] %v1408_v1  ;;  %v1400_v44 = vadd.f32 %v1475_v38, %v1399_v35 }
 0x483   :  { %1424 = vst [vmem:[%s2608_s3 + $0x68] sm:$0xff] %v1400_v44 }

</bundles_post_ra>
